<compile_context>
chip_gen: v7x
topology: tpu7x:2x2x1
jax: 0.10.0
libtpu: 0.0.40
codegen_flags: <defaults>
</compile_context>

<pallas_src>
import jax
import jax.numpy as jnp
import numpy as np
from jax import lax
from jax.experimental import pallas as pl
from jax.experimental.pallas import tpu as pltpu

VOCAB = 5        # len(touchpoint_vocab)
EMB = 16         # embedding_dim
HID = 32         # hidden_dim
GP = 128         # per-gate lane group width (one 128-lane vreg group per gate)


def attribution_lstm_kernel(x_idx_ref,      # SMEM (B, T) int32   (scalar prefetch)
                            gate_lut_ref,   # VMEM (VOCAB, 4*GP)  f32: emb@w_ih + b, groups i|f|o|g
                            w_hh_ref,       # VMEM (H, 4*GP)      f32: hidden->gates, same layout
                            wpack_ref,      # VMEM (H, 2)         f32: [:,0]=attn vec, [:,1]=output weight
                            b_out_ref,      # SMEM (1, 1)         f32: output bias
                            out_ref,        # VMEM (B_TILE, 1)    f32: sigmoid(head)
                            attnw_ref):     # VMEM (B_TILE, T)    f32: attention weights, batch-major
    B_TILE, T = attnw_ref.shape
    H = w_hh_ref.shape[0]

    b0 = pl.program_id(0) * B_TILE          # batch offset of this grid step
    w_hh = w_hh_ref[...]

    # ---- fused gather of input-side gate rows (replaces the old XLA take/transpose/pad) ----
    # gx[t][b] = gate_lut[x_idx[b0+b, t]]  (= emb(x) @ w_ih + b_ih + b_hh, gate-group padded).
    # The gathers only depend on the prefetched SMEM indices, so the scheduler hoists them
    # off the serial h->h critical path.
    def gx_row(b, t):
        return gate_lut_ref[pl.ds(x_idx_ref[b0 + b, t], 1), :]            # (1, 4*GP)
    gx = [jnp.concatenate([gx_row(b, t) for b in range(B_TILE)], axis=0)
          for t in range(T)]                                               # T x (B_TILE, 4*GP)

    # ---- LSTM recurrence, fully unrolled, everything vreg-resident (no hs scratch) ----
    h = jnp.zeros((B_TILE, H), jnp.float32)
    c = jnp.zeros((B_TILE, H), jnp.float32)
    hs = []
    for t in range(T):
        # only this matmul sits on the serial critical path
        gates = gx[t] + jnp.dot(h, w_hh, preferred_element_type=jnp.float32)
        sig = jax.nn.sigmoid(gates[:, :3 * GP])          # i | f | o: one wide EUP push
        i_g = sig[:, 0 * GP:0 * GP + H]                  # every per-gate slice starts at lane
        f_g = sig[:, 1 * GP:1 * GP + H]                  # offset 0 of its own vreg group ->
        o_g = sig[:, 2 * GP:2 * GP + H]                  # no XLU relayouts in the unrolled step
        g_g = jnp.tanh(gates[:, 3 * GP:3 * GP + H])      # candidate gate
        c = f_g * c + i_g * g_g
        h = o_g * jnp.tanh(c)
        hs.append(h)

    # ---- attention over time + sigmoid head (epilogue, off the serial path) ----
    w_attn = wpack_ref[:, 0:1]                           # (H, 1)
    w_out = wpack_ref[:, 1:2]                            # (H, 1)
    logits = [jnp.dot(jnp.tanh(h_t), w_attn, preferred_element_type=jnp.float32)
              for h_t in hs]                             # T x (B_TILE, 1), MXU
    m = logits[0]
    for t in range(1, T):
        m = jnp.maximum(m, logits[t])
    e = [jnp.exp(l - m) for l in logits]
    denom = e[0]
    for t in range(1, T):
        denom = denom + e[t]
    w = [ei / denom for ei in e]                         # softmax over time, T x (B_TILE, 1)

    context = w[0] * hs[0]
    for t in range(1, T):
        context = context + w[t] * hs[t]                 # (B_TILE, H)

    head = (jnp.dot(context, w_out, preferred_element_type=jnp.float32)
            + b_out_ref[0, 0])                           # (B_TILE, 1)
    out_ref[...] = jax.nn.sigmoid(head)
    attnw_ref[...] = jnp.concatenate(w, axis=1)          # (B_TILE, T), already batch-major


def _spread_gates(m, H, gp=GP):
    """(..., 4H) in PyTorch gate order (i, f, g, o) -> (..., 4*gp), groups ordered (i, f, o, g),
    each gate starting at lane offset 0 of its own gp-lane group (zero padded)."""
    i_ = m[..., 0 * H:1 * H]
    f_ = m[..., 1 * H:2 * H]
    g_ = m[..., 2 * H:3 * H]
    o_ = m[..., 3 * H:4 * H]
    pad = [(0, 0)] * (m.ndim - 1) + [(0, gp - H)]
    return jnp.concatenate([jnp.pad(x, pad) for x in (i_, f_, o_, g_)], axis=-1)


@jax.jit
def attribution_lstm(x_idx, params):
    """Wrapper: weight repacking only (per-call constants); all per-token work is in the kernel."""
    emb_table, w_ih, w_hh, b, w_attn, w_out, b_out = params
    B, T = x_idx.shape
    H = HID

    B_TILE = B if B <= 8 else 8
    assert B % B_TILE == 0, "toy wrapper assumes batch divisible by the batch tile"

    # Fold embedding + input projection + combined bias into a (VOCAB, 4*GP) gate LUT,
    # each gate in its own 128-lane group (i, f, o, g).
    gate_lut = _spread_gates(emb_table @ w_ih + b, H)                    # (VOCAB, 4*GP)
    w_hh_p = _spread_gates(w_hh, H)                                      # (H, 4*GP)
    wpack = jnp.concatenate([jnp.transpose(w_attn), w_out], axis=1)      # (H, 2)

    out, attnw = pl.pallas_call(
        attribution_lstm_kernel,
        out_shape=(jax.ShapeDtypeStruct((B, 1), jnp.float32),
                   jax.ShapeDtypeStruct((B, T), jnp.float32)),
        grid_spec=pltpu.PrefetchScalarGridSpec(
            num_scalar_prefetch=1,                                       # x_idx -> SMEM
            grid=(B // B_TILE,),                                         # batch axis (no-op at B=2)
            in_specs=[
                pl.BlockSpec(memory_space=pltpu.MemorySpace.VMEM),       # gate_lut
                pl.BlockSpec(memory_space=pltpu.MemorySpace.VMEM),       # w_hh
                pl.BlockSpec(memory_space=pltpu.MemorySpace.VMEM),       # [w_attn | w_out]
                pl.BlockSpec(memory_space=pltpu.MemorySpace.SMEM),       # b_out scalar
            ],
            out_specs=(
                pl.BlockSpec((B_TILE, 1), lambda i, x_idx: (i, 0)),
                pl.BlockSpec((B_TILE, T), lambda i, x_idx: (i, 0)),
            ),
        ),
        compiler_params=pltpu.CompilerParams(
            dimension_semantics=("parallel",)),                          # v7x: 2 TCs over batch
    )(x_idx.astype(jnp.int32), gate_lut, w_hh_p, wpack, b_out)

    return out[:, 0], attnw                               # (B,), (B, T) — matches out.squeeze(1)


def reference(x_idx, params):
    """Pure-JAX reference matching the PyTorch forward semantics."""
    emb_table, w_ih, w_hh, b, w_attn, w_out, b_out = params
    emb = jnp.take(emb_table, x_idx, axis=0)                             # (B, T, E)
    B, T, _ = emb.shape
    H = HID

    def step(carry, x_t):
        h, c = carry
        gates = x_t @ w_ih + h @ w_hh + b
        i = jax.nn.sigmoid(gates[:, :H])
        f = jax.nn.sigmoid(gates[:, H:2 * H])
        g = jnp.tanh(gates[:, 2 * H:3 * H])
        o = jax.nn.sigmoid(gates[:, 3 * H:])
        c = f * c + i * g
        h = o * jnp.tanh(c)
        return (h, c), h

    (_, _), hs = lax.scan(step,
                          (jnp.zeros((B, H)), jnp.zeros((B, H))),
                          jnp.transpose(emb, (1, 0, 2)))                 # hs: (T, B, H)
    hs_b = jnp.transpose(hs, (1, 0, 2))                                  # (B, T, H)
    scores = jnp.tanh(hs_b)
    logits = scores @ w_attn[0, :, None]                                 # (B, T, 1)
    weights = jax.nn.softmax(logits, axis=1)
    context = jnp.sum(hs_b * weights, axis=1)                            # (B, H)
    out = jax.nn.sigmoid(context @ w_out + b_out)                        # (B, 1)
    return out[:, 0], weights[..., 0]


def init_params(key):
    k = jax.random.split(key, 7)
    scale = 1.0 / np.sqrt(HID)
    emb_table = jax.random.normal(k[0], (VOCAB, EMB), jnp.float32)   # nn.Embedding default N(0,1)
    w_ih = jax.random.uniform(k[1], (EMB, 4 * HID), jnp.float32, -scale, scale)
    w_hh = jax.random.uniform(k[2], (HID, 4 * HID), jnp.float32, -scale, scale)
    b = jax.random.uniform(k[3], (1, 4 * HID), jnp.float32, -scale, scale)  # b_ih + b_hh combined
    w_attn = jax.random.normal(k[4], (1, HID), jnp.float32)         # torch.randn(hidden_dim, 1).T
    w_out = jax.random.uniform(k[5], (HID, 1), jnp.float32, -scale, scale)
    b_out = jax.random.uniform(k[6], (1, 1), jnp.float32, -scale, scale)
    return (emb_table, w_ih, w_hh, b, w_attn, w_out, b_out)


if __name__ == "__main__":
    key = jax.random.PRNGKey(0)
    pkey, xkey = jax.random.split(key)
    params = init_params(pkey)

    B, T = 2, 8
    x = jax.random.randint(xkey, (B, T), 0, VOCAB, dtype=jnp.int32)  # touchpoint index sequences

    out, attn_w = attribution_lstm(x, params)
    out = jax.block_until_ready(out)
    attn_w = jax.block_until_ready(attn_w)

    out_ref, attn_ref = reference(x, params)
    np.testing.assert_allclose(np.asarray(out), np.asarray(out_ref), rtol=1e-5, atol=1e-5)
    np.testing.assert_allclose(np.asarray(attn_w), np.asarray(attn_ref), rtol=1e-5, atol=1e-5)
    assert out.shape == (B,) and attn_w.shape == (B, T)

    print("KERNEL_OK")
</pallas_src>

<mosaic_0001>
module attributes {stable_mosaic.version = 11 : i64} {
  func.func @attribution_lstm_kernel(%arg0: i32, %arg1: memref<2x8xi32, #tpu.memory_space<smem>>, %arg2: memref<5x512xf32, #tpu.memory_space<vmem>>, %arg3: memref<32x512xf32, #tpu.memory_space<vmem>>, %arg4: memref<32x2xf32, #tpu.memory_space<vmem>>, %arg5: memref<1x1xf32, #tpu.memory_space<smem>>, %arg6: memref<2x1xf32, #tpu.memory_space<vmem>>, %arg7: memref<2x8xf32, #tpu.memory_space<vmem>>) attributes {dimension_semantics = [#tpu.dimension_semantics<parallel>], iteration_bounds = array<i64: 1>, scalar_prefetch = 1 : i64, scratch_operands = 0 : i64, tpu.core_type = #tpu.core_type<tc>, window_params = [{pipeline_mode = #tpu.pipeline_mode<synchronous>, transform_indices = @transform_0, window_bounds = array<i64: 5, 512>}, {pipeline_mode = #tpu.pipeline_mode<synchronous>, transform_indices = @transform_1, window_bounds = array<i64: 32, 512>}, {pipeline_mode = #tpu.pipeline_mode<synchronous>, transform_indices = @transform_2, window_bounds = array<i64: 32, 2>}, {transform_indices = @transform_3, window_bounds = array<i64: 1, 1>}, {transform_indices = @transform_4, window_bounds = array<i64: 2, 1>}, {transform_indices = @transform_5, window_bounds = array<i64: 2, 8>}]} {
    %c2_i32 = arith.constant 2 : i32
    %0 = arith.muli %arg0, %c2_i32 : i32
    %c0 = arith.constant 0 : index
    %c0_0 = arith.constant 0 : index
    %1 = vector.load %arg3[%c0, %c0_0] : memref<32x512xf32, #tpu.memory_space<vmem>>, vector<32x512xf32>
    %c0_i32 = arith.constant 0 : i32
    %2 = arith.addi %0, %c0_i32 : i32
    %3 = arith.index_cast %2 : i32 to index
    %c0_1 = arith.constant 0 : index
    %4 = memref.load %arg1[%3, %c0_1] : memref<2x8xi32, #tpu.memory_space<smem>>
    %5 = arith.index_cast %4 : i32 to index
    %c0_2 = arith.constant 0 : index
    %6 = vector.load %arg2[%5, %c0_2] : memref<5x512xf32, #tpu.memory_space<vmem>>, vector<1x512xf32>
    %c1_i32 = arith.constant 1 : i32
    %7 = arith.addi %0, %c1_i32 : i32
    %8 = arith.index_cast %7 : i32 to index
    %c0_3 = arith.constant 0 : index
    %9 = memref.load %arg1[%8, %c0_3] : memref<2x8xi32, #tpu.memory_space<smem>>
    %10 = arith.index_cast %9 : i32 to index
    %c0_4 = arith.constant 0 : index
    %11 = vector.load %arg2[%10, %c0_4] : memref<5x512xf32, #tpu.memory_space<vmem>>, vector<1x512xf32>
    %12 = tpu.concatenate %6, %11 in 0 : vector<1x512xf32>, vector<1x512xf32> -> vector<2x512xf32>
    %c0_i32_5 = arith.constant 0 : i32
    %13 = arith.addi %0, %c0_i32_5 : i32
    %14 = arith.index_cast %13 : i32 to index
    %c1 = arith.constant 1 : index
    %15 = memref.load %arg1[%14, %c1] : memref<2x8xi32, #tpu.memory_space<smem>>
    %16 = arith.index_cast %15 : i32 to index
    %c0_6 = arith.constant 0 : index
    %17 = vector.load %arg2[%16, %c0_6] : memref<5x512xf32, #tpu.memory_space<vmem>>, vector<1x512xf32>
    %c1_i32_7 = arith.constant 1 : i32
    %18 = arith.addi %0, %c1_i32_7 : i32
    %19 = arith.index_cast %18 : i32 to index
    %c1_8 = arith.constant 1 : index
    %20 = memref.load %arg1[%19, %c1_8] : memref<2x8xi32, #tpu.memory_space<smem>>
    %21 = arith.index_cast %20 : i32 to index
    %c0_9 = arith.constant 0 : index
    %22 = vector.load %arg2[%21, %c0_9] : memref<5x512xf32, #tpu.memory_space<vmem>>, vector<1x512xf32>
    %23 = tpu.concatenate %17, %22 in 0 : vector<1x512xf32>, vector<1x512xf32> -> vector<2x512xf32>
    %c0_i32_10 = arith.constant 0 : i32
    %24 = arith.addi %0, %c0_i32_10 : i32
    %25 = arith.index_cast %24 : i32 to index
    %c2 = arith.constant 2 : index
    %26 = memref.load %arg1[%25, %c2] : memref<2x8xi32, #tpu.memory_space<smem>>
    %27 = arith.index_cast %26 : i32 to index
    %c0_11 = arith.constant 0 : index
    %28 = vector.load %arg2[%27, %c0_11] : memref<5x512xf32, #tpu.memory_space<vmem>>, vector<1x512xf32>
    %c1_i32_12 = arith.constant 1 : i32
    %29 = arith.addi %0, %c1_i32_12 : i32
    %30 = arith.index_cast %29 : i32 to index
    %c2_13 = arith.constant 2 : index
    %31 = memref.load %arg1[%30, %c2_13] : memref<2x8xi32, #tpu.memory_space<smem>>
    %32 = arith.index_cast %31 : i32 to index
    %c0_14 = arith.constant 0 : index
    %33 = vector.load %arg2[%32, %c0_14] : memref<5x512xf32, #tpu.memory_space<vmem>>, vector<1x512xf32>
    %34 = tpu.concatenate %28, %33 in 0 : vector<1x512xf32>, vector<1x512xf32> -> vector<2x512xf32>
    %c0_i32_15 = arith.constant 0 : i32
    %35 = arith.addi %0, %c0_i32_15 : i32
    %36 = arith.index_cast %35 : i32 to index
    %c3 = arith.constant 3 : index
    %37 = memref.load %arg1[%36, %c3] : memref<2x8xi32, #tpu.memory_space<smem>>
    %38 = arith.index_cast %37 : i32 to index
    %c0_16 = arith.constant 0 : index
    %39 = vector.load %arg2[%38, %c0_16] : memref<5x512xf32, #tpu.memory_space<vmem>>, vector<1x512xf32>
    %c1_i32_17 = arith.constant 1 : i32
    %40 = arith.addi %0, %c1_i32_17 : i32
    %41 = arith.index_cast %40 : i32 to index
    %c3_18 = arith.constant 3 : index
    %42 = memref.load %arg1[%41, %c3_18] : memref<2x8xi32, #tpu.memory_space<smem>>
    %43 = arith.index_cast %42 : i32 to index
    %c0_19 = arith.constant 0 : index
    %44 = vector.load %arg2[%43, %c0_19] : memref<5x512xf32, #tpu.memory_space<vmem>>, vector<1x512xf32>
    %45 = tpu.concatenate %39, %44 in 0 : vector<1x512xf32>, vector<1x512xf32> -> vector<2x512xf32>
    %c0_i32_20 = arith.constant 0 : i32
    %46 = arith.addi %0, %c0_i32_20 : i32
    %47 = arith.index_cast %46 : i32 to index
    %c4 = arith.constant 4 : index
    %48 = memref.load %arg1[%47, %c4] : memref<2x8xi32, #tpu.memory_space<smem>>
    %49 = arith.index_cast %48 : i32 to index
    %c0_21 = arith.constant 0 : index
    %50 = vector.load %arg2[%49, %c0_21] : memref<5x512xf32, #tpu.memory_space<vmem>>, vector<1x512xf32>
    %c1_i32_22 = arith.constant 1 : i32
    %51 = arith.addi %0, %c1_i32_22 : i32
    %52 = arith.index_cast %51 : i32 to index
    %c4_23 = arith.constant 4 : index
    %53 = memref.load %arg1[%52, %c4_23] : memref<2x8xi32, #tpu.memory_space<smem>>
    %54 = arith.index_cast %53 : i32 to index
    %c0_24 = arith.constant 0 : index
    %55 = vector.load %arg2[%54, %c0_24] : memref<5x512xf32, #tpu.memory_space<vmem>>, vector<1x512xf32>
    %56 = tpu.concatenate %50, %55 in 0 : vector<1x512xf32>, vector<1x512xf32> -> vector<2x512xf32>
    %c0_i32_25 = arith.constant 0 : i32
    %57 = arith.addi %0, %c0_i32_25 : i32
    %58 = arith.index_cast %57 : i32 to index
    %c5 = arith.constant 5 : index
    %59 = memref.load %arg1[%58, %c5] : memref<2x8xi32, #tpu.memory_space<smem>>
    %60 = arith.index_cast %59 : i32 to index
    %c0_26 = arith.constant 0 : index
    %61 = vector.load %arg2[%60, %c0_26] : memref<5x512xf32, #tpu.memory_space<vmem>>, vector<1x512xf32>
    %c1_i32_27 = arith.constant 1 : i32
    %62 = arith.addi %0, %c1_i32_27 : i32
    %63 = arith.index_cast %62 : i32 to index
    %c5_28 = arith.constant 5 : index
    %64 = memref.load %arg1[%63, %c5_28] : memref<2x8xi32, #tpu.memory_space<smem>>
    %65 = arith.index_cast %64 : i32 to index
    %c0_29 = arith.constant 0 : index
    %66 = vector.load %arg2[%65, %c0_29] : memref<5x512xf32, #tpu.memory_space<vmem>>, vector<1x512xf32>
    %67 = tpu.concatenate %61, %66 in 0 : vector<1x512xf32>, vector<1x512xf32> -> vector<2x512xf32>
    %c0_i32_30 = arith.constant 0 : i32
    %68 = arith.addi %0, %c0_i32_30 : i32
    %69 = arith.index_cast %68 : i32 to index
    %c6 = arith.constant 6 : index
    %70 = memref.load %arg1[%69, %c6] : memref<2x8xi32, #tpu.memory_space<smem>>
    %71 = arith.index_cast %70 : i32 to index
    %c0_31 = arith.constant 0 : index
    %72 = vector.load %arg2[%71, %c0_31] : memref<5x512xf32, #tpu.memory_space<vmem>>, vector<1x512xf32>
    %c1_i32_32 = arith.constant 1 : i32
    %73 = arith.addi %0, %c1_i32_32 : i32
    %74 = arith.index_cast %73 : i32 to index
    %c6_33 = arith.constant 6 : index
    %75 = memref.load %arg1[%74, %c6_33] : memref<2x8xi32, #tpu.memory_space<smem>>
    %76 = arith.index_cast %75 : i32 to index
    %c0_34 = arith.constant 0 : index
    %77 = vector.load %arg2[%76, %c0_34] : memref<5x512xf32, #tpu.memory_space<vmem>>, vector<1x512xf32>
    %78 = tpu.concatenate %72, %77 in 0 : vector<1x512xf32>, vector<1x512xf32> -> vector<2x512xf32>
    %c0_i32_35 = arith.constant 0 : i32
    %79 = arith.addi %0, %c0_i32_35 : i32
    %80 = arith.index_cast %79 : i32 to index
    %c7 = arith.constant 7 : index
    %81 = memref.load %arg1[%80, %c7] : memref<2x8xi32, #tpu.memory_space<smem>>
    %82 = arith.index_cast %81 : i32 to index
    %c0_36 = arith.constant 0 : index
    %83 = vector.load %arg2[%82, %c0_36] : memref<5x512xf32, #tpu.memory_space<vmem>>, vector<1x512xf32>
    %c1_i32_37 = arith.constant 1 : i32
    %84 = arith.addi %0, %c1_i32_37 : i32
    %85 = arith.index_cast %84 : i32 to index
    %c7_38 = arith.constant 7 : index
    %86 = memref.load %arg1[%85, %c7_38] : memref<2x8xi32, #tpu.memory_space<smem>>
    %87 = arith.index_cast %86 : i32 to index
    %c0_39 = arith.constant 0 : index
    %88 = vector.load %arg2[%87, %c0_39] : memref<5x512xf32, #tpu.memory_space<vmem>>, vector<1x512xf32>
    %89 = tpu.concatenate %83, %88 in 0 : vector<1x512xf32>, vector<1x512xf32> -> vector<2x512xf32>
    %cst = arith.constant 0.000000e+00 : f32
    %90 = vector.broadcast %cst : f32 to vector<2x32xf32>
    %cst_40 = arith.constant 0.000000e+00 : f32
    %91 = vector.broadcast %cst_40 : f32 to vector<2x32xf32>
    %cst_41 = arith.constant dense<0.000000e+00> : vector<2x512xf32>
    %92 = tpu.matmul %90, %1, %cst_41 {dimension_numbers = #tpu.dot_dimension_numbers<[1], [0], [0], [1], [0, 0, 1, 1], [], []>} : vector<2x32xf32>, vector<32x512xf32>, vector<2x512xf32> -> vector<2x512xf32>
    %93 = arith.addf %12, %92 : vector<2x512xf32>
    %94 = vector.extract_strided_slice %93 {offsets = [0, 0], sizes = [2, 384], strides = [1, 1]} : vector<2x512xf32> to vector<2x384xf32>
    %95 = arith.negf %94 : vector<2x384xf32>
    %96 = math.exp %95 : vector<2x384xf32>
    %cst_42 = arith.constant 1.000000e+00 : f32
    %97 = vector.broadcast %cst_42 : f32 to vector<2x384xf32>
    %98 = arith.addf %97, %96 : vector<2x384xf32>
    %99 = arith.divf %97, %98 : vector<2x384xf32>
    %100 = vector.extract_strided_slice %99 {offsets = [0, 0], sizes = [2, 32], strides = [1, 1]} : vector<2x384xf32> to vector<2x32xf32>
    %101 = vector.extract_strided_slice %99 {offsets = [0, 128], sizes = [2, 32], strides = [1, 1]} : vector<2x384xf32> to vector<2x32xf32>
    %102 = vector.extract_strided_slice %99 {offsets = [0, 256], sizes = [2, 32], strides = [1, 1]} : vector<2x384xf32> to vector<2x32xf32>
    %103 = vector.extract_strided_slice %93 {offsets = [0, 384], sizes = [2, 32], strides = [1, 1]} : vector<2x512xf32> to vector<2x32xf32>
    %104 = math.tanh %103 : vector<2x32xf32>
    %105 = arith.mulf %101, %91 : vector<2x32xf32>
    %106 = arith.mulf %100, %104 : vector<2x32xf32>
    %107 = arith.addf %105, %106 : vector<2x32xf32>
    %108 = math.tanh %107 : vector<2x32xf32>
    %109 = arith.mulf %102, %108 : vector<2x32xf32>
    %cst_43 = arith.constant dense<0.000000e+00> : vector<2x512xf32>
    %110 = tpu.matmul %109, %1, %cst_43 {dimension_numbers = #tpu.dot_dimension_numbers<[1], [0], [0], [1], [0, 0, 1, 1], [], []>} : vector<2x32xf32>, vector<32x512xf32>, vector<2x512xf32> -> vector<2x512xf32>
    %111 = arith.addf %23, %110 : vector<2x512xf32>
    %112 = vector.extract_strided_slice %111 {offsets = [0, 0], sizes = [2, 384], strides = [1, 1]} : vector<2x512xf32> to vector<2x384xf32>
    %113 = arith.negf %112 : vector<2x384xf32>
    %114 = math.exp %113 : vector<2x384xf32>
    %cst_44 = arith.constant 1.000000e+00 : f32
    %115 = vector.broadcast %cst_44 : f32 to vector<2x384xf32>
    %116 = arith.addf %115, %114 : vector<2x384xf32>
    %117 = arith.divf %115, %116 : vector<2x384xf32>
    %118 = vector.extract_strided_slice %117 {offsets = [0, 0], sizes = [2, 32], strides = [1, 1]} : vector<2x384xf32> to vector<2x32xf32>
    %119 = vector.extract_strided_slice %117 {offsets = [0, 128], sizes = [2, 32], strides = [1, 1]} : vector<2x384xf32> to vector<2x32xf32>
    %120 = vector.extract_strided_slice %117 {offsets = [0, 256], sizes = [2, 32], strides = [1, 1]} : vector<2x384xf32> to vector<2x32xf32>
    %121 = vector.extract_strided_slice %111 {offsets = [0, 384], sizes = [2, 32], strides = [1, 1]} : vector<2x512xf32> to vector<2x32xf32>
    %122 = math.tanh %121 : vector<2x32xf32>
    %123 = arith.mulf %119, %107 : vector<2x32xf32>
    %124 = arith.mulf %118, %122 : vector<2x32xf32>
    %125 = arith.addf %123, %124 : vector<2x32xf32>
    %126 = math.tanh %125 : vector<2x32xf32>
    %127 = arith.mulf %120, %126 : vector<2x32xf32>
    %cst_45 = arith.constant dense<0.000000e+00> : vector<2x512xf32>
    %128 = tpu.matmul %127, %1, %cst_45 {dimension_numbers = #tpu.dot_dimension_numbers<[1], [0], [0], [1], [0, 0, 1, 1], [], []>} : vector<2x32xf32>, vector<32x512xf32>, vector<2x512xf32> -> vector<2x512xf32>
    %129 = arith.addf %34, %128 : vector<2x512xf32>
    %130 = vector.extract_strided_slice %129 {offsets = [0, 0], sizes = [2, 384], strides = [1, 1]} : vector<2x512xf32> to vector<2x384xf32>
    %131 = arith.negf %130 : vector<2x384xf32>
    %132 = math.exp %131 : vector<2x384xf32>
    %cst_46 = arith.constant 1.000000e+00 : f32
    %133 = vector.broadcast %cst_46 : f32 to vector<2x384xf32>
    %134 = arith.addf %133, %132 : vector<2x384xf32>
    %135 = arith.divf %133, %134 : vector<2x384xf32>
    %136 = vector.extract_strided_slice %135 {offsets = [0, 0], sizes = [2, 32], strides = [1, 1]} : vector<2x384xf32> to vector<2x32xf32>
    %137 = vector.extract_strided_slice %135 {offsets = [0, 128], sizes = [2, 32], strides = [1, 1]} : vector<2x384xf32> to vector<2x32xf32>
    %138 = vector.extract_strided_slice %135 {offsets = [0, 256], sizes = [2, 32], strides = [1, 1]} : vector<2x384xf32> to vector<2x32xf32>
    %139 = vector.extract_strided_slice %129 {offsets = [0, 384], sizes = [2, 32], strides = [1, 1]} : vector<2x512xf32> to vector<2x32xf32>
    %140 = math.tanh %139 : vector<2x32xf32>
    %141 = arith.mulf %137, %125 : vector<2x32xf32>
    %142 = arith.mulf %136, %140 : vector<2x32xf32>
    %143 = arith.addf %141, %142 : vector<2x32xf32>
    %144 = math.tanh %143 : vector<2x32xf32>
    %145 = arith.mulf %138, %144 : vector<2x32xf32>
    %cst_47 = arith.constant dense<0.000000e+00> : vector<2x512xf32>
    %146 = tpu.matmul %145, %1, %cst_47 {dimension_numbers = #tpu.dot_dimension_numbers<[1], [0], [0], [1], [0, 0, 1, 1], [], []>} : vector<2x32xf32>, vector<32x512xf32>, vector<2x512xf32> -> vector<2x512xf32>
    %147 = arith.addf %45, %146 : vector<2x512xf32>
    %148 = vector.extract_strided_slice %147 {offsets = [0, 0], sizes = [2, 384], strides = [1, 1]} : vector<2x512xf32> to vector<2x384xf32>
    %149 = arith.negf %148 : vector<2x384xf32>
    %150 = math.exp %149 : vector<2x384xf32>
    %cst_48 = arith.constant 1.000000e+00 : f32
    %151 = vector.broadcast %cst_48 : f32 to vector<2x384xf32>
    %152 = arith.addf %151, %150 : vector<2x384xf32>
    %153 = arith.divf %151, %152 : vector<2x384xf32>
    %154 = vector.extract_strided_slice %153 {offsets = [0, 0], sizes = [2, 32], strides = [1, 1]} : vector<2x384xf32> to vector<2x32xf32>
    %155 = vector.extract_strided_slice %153 {offsets = [0, 128], sizes = [2, 32], strides = [1, 1]} : vector<2x384xf32> to vector<2x32xf32>
    %156 = vector.extract_strided_slice %153 {offsets = [0, 256], sizes = [2, 32], strides = [1, 1]} : vector<2x384xf32> to vector<2x32xf32>
    %157 = vector.extract_strided_slice %147 {offsets = [0, 384], sizes = [2, 32], strides = [1, 1]} : vector<2x512xf32> to vector<2x32xf32>
    %158 = math.tanh %157 : vector<2x32xf32>
    %159 = arith.mulf %155, %143 : vector<2x32xf32>
    %160 = arith.mulf %154, %158 : vector<2x32xf32>
    %161 = arith.addf %159, %160 : vector<2x32xf32>
    %162 = math.tanh %161 : vector<2x32xf32>
    %163 = arith.mulf %156, %162 : vector<2x32xf32>
    %cst_49 = arith.constant dense<0.000000e+00> : vector<2x512xf32>
    %164 = tpu.matmul %163, %1, %cst_49 {dimension_numbers = #tpu.dot_dimension_numbers<[1], [0], [0], [1], [0, 0, 1, 1], [], []>} : vector<2x32xf32>, vector<32x512xf32>, vector<2x512xf32> -> vector<2x512xf32>
    %165 = arith.addf %56, %164 : vector<2x512xf32>
    %166 = vector.extract_strided_slice %165 {offsets = [0, 0], sizes = [2, 384], strides = [1, 1]} : vector<2x512xf32> to vector<2x384xf32>
    %167 = arith.negf %166 : vector<2x384xf32>
    %168 = math.exp %167 : vector<2x384xf32>
    %cst_50 = arith.constant 1.000000e+00 : f32
    %169 = vector.broadcast %cst_50 : f32 to vector<2x384xf32>
    %170 = arith.addf %169, %168 : vector<2x384xf32>
    %171 = arith.divf %169, %170 : vector<2x384xf32>
    %172 = vector.extract_strided_slice %171 {offsets = [0, 0], sizes = [2, 32], strides = [1, 1]} : vector<2x384xf32> to vector<2x32xf32>
    %173 = vector.extract_strided_slice %171 {offsets = [0, 128], sizes = [2, 32], strides = [1, 1]} : vector<2x384xf32> to vector<2x32xf32>
    %174 = vector.extract_strided_slice %171 {offsets = [0, 256], sizes = [2, 32], strides = [1, 1]} : vector<2x384xf32> to vector<2x32xf32>
    %175 = vector.extract_strided_slice %165 {offsets = [0, 384], sizes = [2, 32], strides = [1, 1]} : vector<2x512xf32> to vector<2x32xf32>
    %176 = math.tanh %175 : vector<2x32xf32>
    %177 = arith.mulf %173, %161 : vector<2x32xf32>
    %178 = arith.mulf %172, %176 : vector<2x32xf32>
    %179 = arith.addf %177, %178 : vector<2x32xf32>
    %180 = math.tanh %179 : vector<2x32xf32>
    %181 = arith.mulf %174, %180 : vector<2x32xf32>
    %cst_51 = arith.constant dense<0.000000e+00> : vector<2x512xf32>
    %182 = tpu.matmul %181, %1, %cst_51 {dimension_numbers = #tpu.dot_dimension_numbers<[1], [0], [0], [1], [0, 0, 1, 1], [], []>} : vector<2x32xf32>, vector<32x512xf32>, vector<2x512xf32> -> vector<2x512xf32>
    %183 = arith.addf %67, %182 : vector<2x512xf32>
    %184 = vector.extract_strided_slice %183 {offsets = [0, 0], sizes = [2, 384], strides = [1, 1]} : vector<2x512xf32> to vector<2x384xf32>
    %185 = arith.negf %184 : vector<2x384xf32>
    %186 = math.exp %185 : vector<2x384xf32>
    %cst_52 = arith.constant 1.000000e+00 : f32
    %187 = vector.broadcast %cst_52 : f32 to vector<2x384xf32>
    %188 = arith.addf %187, %186 : vector<2x384xf32>
    %189 = arith.divf %187, %188 : vector<2x384xf32>
    %190 = vector.extract_strided_slice %189 {offsets = [0, 0], sizes = [2, 32], strides = [1, 1]} : vector<2x384xf32> to vector<2x32xf32>
    %191 = vector.extract_strided_slice %189 {offsets = [0, 128], sizes = [2, 32], strides = [1, 1]} : vector<2x384xf32> to vector<2x32xf32>
    %192 = vector.extract_strided_slice %189 {offsets = [0, 256], sizes = [2, 32], strides = [1, 1]} : vector<2x384xf32> to vector<2x32xf32>
    %193 = vector.extract_strided_slice %183 {offsets = [0, 384], sizes = [2, 32], strides = [1, 1]} : vector<2x512xf32> to vector<2x32xf32>
    %194 = math.tanh %193 : vector<2x32xf32>
    %195 = arith.mulf %191, %179 : vector<2x32xf32>
    %196 = arith.mulf %190, %194 : vector<2x32xf32>
    %197 = arith.addf %195, %196 : vector<2x32xf32>
    %198 = math.tanh %197 : vector<2x32xf32>
    %199 = arith.mulf %192, %198 : vector<2x32xf32>
    %cst_53 = arith.constant dense<0.000000e+00> : vector<2x512xf32>
    %200 = tpu.matmul %199, %1, %cst_53 {dimension_numbers = #tpu.dot_dimension_numbers<[1], [0], [0], [1], [0, 0, 1, 1], [], []>} : vector<2x32xf32>, vector<32x512xf32>, vector<2x512xf32> -> vector<2x512xf32>
    %201 = arith.addf %78, %200 : vector<2x512xf32>
    %202 = vector.extract_strided_slice %201 {offsets = [0, 0], sizes = [2, 384], strides = [1, 1]} : vector<2x512xf32> to vector<2x384xf32>
    %203 = arith.negf %202 : vector<2x384xf32>
    %204 = math.exp %203 : vector<2x384xf32>
    %cst_54 = arith.constant 1.000000e+00 : f32
    %205 = vector.broadcast %cst_54 : f32 to vector<2x384xf32>
    %206 = arith.addf %205, %204 : vector<2x384xf32>
    %207 = arith.divf %205, %206 : vector<2x384xf32>
    %208 = vector.extract_strided_slice %207 {offsets = [0, 0], sizes = [2, 32], strides = [1, 1]} : vector<2x384xf32> to vector<2x32xf32>
    %209 = vector.extract_strided_slice %207 {offsets = [0, 128], sizes = [2, 32], strides = [1, 1]} : vector<2x384xf32> to vector<2x32xf32>
    %210 = vector.extract_strided_slice %207 {offsets = [0, 256], sizes = [2, 32], strides = [1, 1]} : vector<2x384xf32> to vector<2x32xf32>
    %211 = vector.extract_strided_slice %201 {offsets = [0, 384], sizes = [2, 32], strides = [1, 1]} : vector<2x512xf32> to vector<2x32xf32>
    %212 = math.tanh %211 : vector<2x32xf32>
    %213 = arith.mulf %209, %197 : vector<2x32xf32>
    %214 = arith.mulf %208, %212 : vector<2x32xf32>
    %215 = arith.addf %213, %214 : vector<2x32xf32>
    %216 = math.tanh %215 : vector<2x32xf32>
    %217 = arith.mulf %210, %216 : vector<2x32xf32>
    %cst_55 = arith.constant dense<0.000000e+00> : vector<2x512xf32>
    %218 = tpu.matmul %217, %1, %cst_55 {dimension_numbers = #tpu.dot_dimension_numbers<[1], [0], [0], [1], [0, 0, 1, 1], [], []>} : vector<2x32xf32>, vector<32x512xf32>, vector<2x512xf32> -> vector<2x512xf32>
    %219 = arith.addf %89, %218 : vector<2x512xf32>
    %220 = vector.extract_strided_slice %219 {offsets = [0, 0], sizes = [2, 384], strides = [1, 1]} : vector<2x512xf32> to vector<2x384xf32>
    %221 = arith.negf %220 : vector<2x384xf32>
    %222 = math.exp %221 : vector<2x384xf32>
    %cst_56 = arith.constant 1.000000e+00 : f32
    %223 = vector.broadcast %cst_56 : f32 to vector<2x384xf32>
    %224 = arith.addf %223, %222 : vector<2x384xf32>
    %225 = arith.divf %223, %224 : vector<2x384xf32>
    %226 = vector.extract_strided_slice %225 {offsets = [0, 0], sizes = [2, 32], strides = [1, 1]} : vector<2x384xf32> to vector<2x32xf32>
    %227 = vector.extract_strided_slice %225 {offsets = [0, 128], sizes = [2, 32], strides = [1, 1]} : vector<2x384xf32> to vector<2x32xf32>
    %228 = vector.extract_strided_slice %225 {offsets = [0, 256], sizes = [2, 32], strides = [1, 1]} : vector<2x384xf32> to vector<2x32xf32>
    %229 = vector.extract_strided_slice %219 {offsets = [0, 384], sizes = [2, 32], strides = [1, 1]} : vector<2x512xf32> to vector<2x32xf32>
    %230 = math.tanh %229 : vector<2x32xf32>
    %231 = arith.mulf %227, %215 : vector<2x32xf32>
    %232 = arith.mulf %226, %230 : vector<2x32xf32>
    %233 = arith.addf %231, %232 : vector<2x32xf32>
    %234 = math.tanh %233 : vector<2x32xf32>
    %235 = arith.mulf %228, %234 : vector<2x32xf32>
    %c0_57 = arith.constant 0 : index
    %c0_58 = arith.constant 0 : index
    %236 = vector.load %arg4[%c0_57, %c0_58] : memref<32x2xf32, #tpu.memory_space<vmem>>, vector<32x1xf32>
    %c0_59 = arith.constant 0 : index
    %c1_60 = arith.constant 1 : index
    %237 = vector.load %arg4[%c0_59, %c1_60] : memref<32x2xf32, #tpu.memory_space<vmem>>, vector<32x1xf32>
    %238 = math.tanh %109 : vector<2x32xf32>
    %cst_61 = arith.constant dense<0.000000e+00> : vector<2x1xf32>
    %239 = tpu.matmul %238, %236, %cst_61 {dimension_numbers = #tpu.dot_dimension_numbers<[1], [0], [0], [1], [0, 0, 1, 1], [], []>} : vector<2x32xf32>, vector<32x1xf32>, vector<2x1xf32> -> vector<2x1xf32>
    %240 = math.tanh %127 : vector<2x32xf32>
    %cst_62 = arith.constant dense<0.000000e+00> : vector<2x1xf32>
    %241 = tpu.matmul %240, %236, %cst_62 {dimension_numbers = #tpu.dot_dimension_numbers<[1], [0], [0], [1], [0, 0, 1, 1], [], []>} : vector<2x32xf32>, vector<32x1xf32>, vector<2x1xf32> -> vector<2x1xf32>
    %242 = math.tanh %145 : vector<2x32xf32>
    %cst_63 = arith.constant dense<0.000000e+00> : vector<2x1xf32>
    %243 = tpu.matmul %242, %236, %cst_63 {dimension_numbers = #tpu.dot_dimension_numbers<[1], [0], [0], [1], [0, 0, 1, 1], [], []>} : vector<2x32xf32>, vector<32x1xf32>, vector<2x1xf32> -> vector<2x1xf32>
    %244 = math.tanh %163 : vector<2x32xf32>
    %cst_64 = arith.constant dense<0.000000e+00> : vector<2x1xf32>
    %245 = tpu.matmul %244, %236, %cst_64 {dimension_numbers = #tpu.dot_dimension_numbers<[1], [0], [0], [1], [0, 0, 1, 1], [], []>} : vector<2x32xf32>, vector<32x1xf32>, vector<2x1xf32> -> vector<2x1xf32>
    %246 = math.tanh %181 : vector<2x32xf32>
    %cst_65 = arith.constant dense<0.000000e+00> : vector<2x1xf32>
    %247 = tpu.matmul %246, %236, %cst_65 {dimension_numbers = #tpu.dot_dimension_numbers<[1], [0], [0], [1], [0, 0, 1, 1], [], []>} : vector<2x32xf32>, vector<32x1xf32>, vector<2x1xf32> -> vector<2x1xf32>
    %248 = math.tanh %199 : vector<2x32xf32>
    %cst_66 = arith.constant dense<0.000000e+00> : vector<2x1xf32>
    %249 = tpu.matmul %248, %236, %cst_66 {dimension_numbers = #tpu.dot_dimension_numbers<[1], [0], [0], [1], [0, 0, 1, 1], [], []>} : vector<2x32xf32>, vector<32x1xf32>, vector<2x1xf32> -> vector<2x1xf32>
    %250 = math.tanh %217 : vector<2x32xf32>
    %cst_67 = arith.constant dense<0.000000e+00> : vector<2x1xf32>
    %251 = tpu.matmul %250, %236, %cst_67 {dimension_numbers = #tpu.dot_dimension_numbers<[1], [0], [0], [1], [0, 0, 1, 1], [], []>} : vector<2x32xf32>, vector<32x1xf32>, vector<2x1xf32> -> vector<2x1xf32>
    %252 = math.tanh %235 : vector<2x32xf32>
    %cst_68 = arith.constant dense<0.000000e+00> : vector<2x1xf32>
    %253 = tpu.matmul %252, %236, %cst_68 {dimension_numbers = #tpu.dot_dimension_numbers<[1], [0], [0], [1], [0, 0, 1, 1], [], []>} : vector<2x32xf32>, vector<32x1xf32>, vector<2x1xf32> -> vector<2x1xf32>
    %254 = arith.maximumf %239, %241 : vector<2x1xf32>
    %255 = arith.maximumf %254, %243 : vector<2x1xf32>
    %256 = arith.maximumf %255, %245 : vector<2x1xf32>
    %257 = arith.maximumf %256, %247 : vector<2x1xf32>
    %258 = arith.maximumf %257, %249 : vector<2x1xf32>
    %259 = arith.maximumf %258, %251 : vector<2x1xf32>
    %260 = arith.maximumf %259, %253 : vector<2x1xf32>
    %261 = arith.subf %239, %260 : vector<2x1xf32>
    %262 = math.exp %261 : vector<2x1xf32>
    %263 = arith.subf %241, %260 : vector<2x1xf32>
    %264 = math.exp %263 : vector<2x1xf32>
    %265 = arith.subf %243, %260 : vector<2x1xf32>
    %266 = math.exp %265 : vector<2x1xf32>
    %267 = arith.subf %245, %260 : vector<2x1xf32>
    %268 = math.exp %267 : vector<2x1xf32>
    %269 = arith.subf %247, %260 : vector<2x1xf32>
    %270 = math.exp %269 : vector<2x1xf32>
    %271 = arith.subf %249, %260 : vector<2x1xf32>
    %272 = math.exp %271 : vector<2x1xf32>
    %273 = arith.subf %251, %260 : vector<2x1xf32>
    %274 = math.exp %273 : vector<2x1xf32>
    %275 = arith.subf %253, %260 : vector<2x1xf32>
    %276 = math.exp %275 : vector<2x1xf32>
    %277 = arith.addf %262, %264 : vector<2x1xf32>
    %278 = arith.addf %277, %266 : vector<2x1xf32>
    %279 = arith.addf %278, %268 : vector<2x1xf32>
    %280 = arith.addf %279, %270 : vector<2x1xf32>
    %281 = arith.addf %280, %272 : vector<2x1xf32>
    %282 = arith.addf %281, %274 : vector<2x1xf32>
    %283 = arith.addf %282, %276 : vector<2x1xf32>
    %284 = arith.divf %262, %283 : vector<2x1xf32>
    %285 = arith.divf %264, %283 : vector<2x1xf32>
    %286 = arith.divf %266, %283 : vector<2x1xf32>
    %287 = arith.divf %268, %283 : vector<2x1xf32>
    %288 = arith.divf %270, %283 : vector<2x1xf32>
    %289 = arith.divf %272, %283 : vector<2x1xf32>
    %290 = arith.divf %274, %283 : vector<2x1xf32>
    %291 = arith.divf %276, %283 : vector<2x1xf32>
    %292 = vector.broadcast %284 : vector<2x1xf32> to vector<2x32xf32>
    %293 = arith.mulf %292, %109 : vector<2x32xf32>
    %294 = vector.broadcast %285 : vector<2x1xf32> to vector<2x32xf32>
    %295 = arith.mulf %294, %127 : vector<2x32xf32>
    %296 = arith.addf %293, %295 : vector<2x32xf32>
    %297 = vector.broadcast %286 : vector<2x1xf32> to vector<2x32xf32>
    %298 = arith.mulf %297, %145 : vector<2x32xf32>
    %299 = arith.addf %296, %298 : vector<2x32xf32>
    %300 = vector.broadcast %287 : vector<2x1xf32> to vector<2x32xf32>
    %301 = arith.mulf %300, %163 : vector<2x32xf32>
    %302 = arith.addf %299, %301 : vector<2x32xf32>
    %303 = vector.broadcast %288 : vector<2x1xf32> to vector<2x32xf32>
    %304 = arith.mulf %303, %181 : vector<2x32xf32>
    %305 = arith.addf %302, %304 : vector<2x32xf32>
    %306 = vector.broadcast %289 : vector<2x1xf32> to vector<2x32xf32>
    %307 = arith.mulf %306, %199 : vector<2x32xf32>
    %308 = arith.addf %305, %307 : vector<2x32xf32>
    %309 = vector.broadcast %290 : vector<2x1xf32> to vector<2x32xf32>
    %310 = arith.mulf %309, %217 : vector<2x32xf32>
    %311 = arith.addf %308, %310 : vector<2x32xf32>
    %312 = vector.broadcast %291 : vector<2x1xf32> to vector<2x32xf32>
    %313 = arith.mulf %312, %235 : vector<2x32xf32>
    %314 = arith.addf %311, %313 : vector<2x32xf32>
    %cst_69 = arith.constant dense<0.000000e+00> : vector<2x1xf32>
    %315 = tpu.matmul %314, %237, %cst_69 {dimension_numbers = #tpu.dot_dimension_numbers<[1], [0], [0], [1], [0, 0, 1, 1], [], []>} : vector<2x32xf32>, vector<32x1xf32>, vector<2x1xf32> -> vector<2x1xf32>
    %c0_70 = arith.constant 0 : index
    %c0_71 = arith.constant 0 : index
    %316 = memref.load %arg5[%c0_70, %c0_71] : memref<1x1xf32, #tpu.memory_space<smem>>
    %317 = vector.broadcast %316 : f32 to vector<2x1xf32>
    %318 = arith.addf %315, %317 : vector<2x1xf32>
    %319 = arith.negf %318 : vector<2x1xf32>
    %320 = math.exp %319 : vector<2x1xf32>
    %cst_72 = arith.constant 1.000000e+00 : f32
    %321 = vector.broadcast %cst_72 : f32 to vector<2x1xf32>
    %322 = arith.addf %321, %320 : vector<2x1xf32>
    %323 = arith.divf %321, %322 : vector<2x1xf32>
    %c0_73 = arith.constant 0 : index
    %c0_74 = arith.constant 0 : index
    %324 = vector.load %arg6[%c0_73, %c0_74] : memref<2x1xf32, #tpu.memory_space<vmem>>, vector<2x1xf32>
    tpu.vector_store %arg6[%c0_73, %c0_74], %323 {strides = array<i32>} : memref<2x1xf32, #tpu.memory_space<vmem>>, vector<2x1xf32>,
    %325 = tpu.concatenate %284, %285, %286, %287, %288, %289, %290, %291 in 1 : vector<2x1xf32>, vector<2x1xf32>, vector<2x1xf32>, vector<2x1xf32>, vector<2x1xf32>, vector<2x1xf32>, vector<2x1xf32>, vector<2x1xf32> -> vector<2x8xf32>
    %c0_75 = arith.constant 0 : index
    %c0_76 = arith.constant 0 : index
    %326 = vector.load %arg7[%c0_75, %c0_76] : memref<2x8xf32, #tpu.memory_space<vmem>>, vector<2x8xf32>
    tpu.vector_store %arg7[%c0_75, %c0_76], %325 {strides = array<i32>} : memref<2x8xf32, #tpu.memory_space<vmem>>, vector<2x8xf32>,
    return
  }
  func.func @transform_0(%arg0: i32, %arg1: memref<2x8xi32, #tpu.memory_space<smem>>) -> (i32, i32) {
    %c0_i32 = arith.constant 0 : i32
    %c0_i32_0 = arith.constant 0 : i32
    %c0_i32_1 = arith.constant 0 : i32
    return %c0_i32, %c0_i32_0 : i32, i32
  }
  func.func @transform_1(%arg0: i32, %arg1: memref<2x8xi32, #tpu.memory_space<smem>>) -> (i32, i32) {
    %c0_i32 = arith.constant 0 : i32
    %c0_i32_0 = arith.constant 0 : i32
    %c0_i32_1 = arith.constant 0 : i32
    return %c0_i32, %c0_i32_0 : i32, i32
  }
  func.func @transform_2(%arg0: i32, %arg1: memref<2x8xi32, #tpu.memory_space<smem>>) -> (i32, i32) {
    %c0_i32 = arith.constant 0 : i32
    %c0_i32_0 = arith.constant 0 : i32
    %c0_i32_1 = arith.constant 0 : i32
    return %c0_i32, %c0_i32_0 : i32, i32
  }
  func.func @transform_3(%arg0: i32, %arg1: memref<2x8xi32, #tpu.memory_space<smem>>) -> (i32, i32) {
    %c0_i32 = arith.constant 0 : i32
    %c0_i32_0 = arith.constant 0 : i32
    %c0_i32_1 = arith.constant 0 : i32
    return %c0_i32, %c0_i32_0 : i32, i32
  }
  func.func @transform_4(%arg0: i32, %arg1: memref<2x8xi32, #tpu.memory_space<smem>>) -> (i32, i32) {
    %c0_i32 = arith.constant 0 : i32
    %c0_i32_0 = arith.constant 0 : i32
    return %arg0, %c0_i32 : i32, i32
  }
  func.func @transform_5(%arg0: i32, %arg1: memref<2x8xi32, #tpu.memory_space<smem>>) -> (i32, i32) {
    %c0_i32 = arith.constant 0 : i32
    %c0_i32_0 = arith.constant 0 : i32
    return %arg0, %c0_i32 : i32, i32
  }
}

</mosaic_0001>

<bundles_post_ra>
// kernel: attribution_lstm.1
= control target key start
LH: loop header
LB: loop body
LE: loop exit
PB: predicated region body
PF: predicated region fallthrough
CT: control target
= control target key end

     0   :  { %s4076_s0 = inlined_call_operand.vmem [shape: s32[2,8], index: 0, kind: input, shape index: {}]   ;;  %s4077_s1 = inlined_call_operand.vmem [shape: f32[5,512], index: 1, kind: input, shape index: {}]   ;;  %s4078_s2 = inlined_call_operand.vmem [shape: f32[32,512], index: 2, kind: input, shape index: {}]   ;;  %s4079_s3 = inlined_call_operand.vmem [shape: f32[32,2], index: 3, kind: input, shape index: {}]   ;;  %s4080_s4 = inlined_call_operand.<no memory space> [shape: f32[1,1], index: 4, kind: input, shape index: {}]   ;;  %s4081_s5 = inlined_call_operand.vmem [shape: f32[2,1], index: 5, kind: output, shape index: {0}]   ;;  %s4082_s6 = inlined_call_operand.hbm [shape: f32[2,8], index: 6, kind: output, shape index: {1}]  }
   0x1   :  { %s12_s23 = sshll.u32 %s4076_s0, 4  ;;  %s13_s23 = int_to_ptr.vmem [resolvable:$true] %s12_s23 }
   0x2   :  { %s3505_s24 = scalar_lea.vmem %s13_s23, 32  ;;  %p3510_p1 = scmp.lt.s32.totalorder %s13_s23, %s13_s23 }
   0x3   :  { %p3506_p0 = scmp.ne.s32.totalorder %s13_s23, %s3505_s24  ;;  %p3511_p2 = scmp.lt.s32.totalorder %s3505_s24, %s3505_s24 }
   0x5   :  { %p3512_p3 = por %p3511_p2, %p3510_p1 }
   0x7   :  { %p3513_p4 = pnand %p3512_p3, %p3506_p0 }
   0x9   :  { %3516 = shalt.err (!%p3513_p4)  }
   0xa   :  { %s3543_s25 = smov [#allocation3]  }
   0xb   :  { %15 = dma.vmem_to_smem %s13_s23, 32, %s3543_s25, [#allocation2] }
   0xc   :  { %3539 = dma.done.wait [#allocation2], 32 }
   0xd   :  { %3540 = vsyncadd [#allocation2], 4294967264 }
   0xe   :  { %18 = sfence }
   0xf   :  { %v30_v0 = vld [vmem:[%s4078_s2 + $0x8] sm:$0xff]  ;;  %v29_v2 = vld [vmem:[%s4078_s2] sm:$0xff]  ;;  %v3544_v7 = vmov 0.0   ;;  %v32_v12 = vld [vmem:[%s4078_s2 + $0x18] sm:$0xff] }
  0x10   :  { %v34_v1 = vld [vmem:[%s4078_s2 + $0x28] sm:$0xff]  ;;  %v33_v4 = vld [vmem:[%s4078_s2 + $0x20] sm:$0xff]  ;;  %659 = vmatprep.mubr.f32.mxu0 %v3544_v7  ;;  %730 = vmatprep.mubr.f32.mxu1 %v3544_v7  ;;  %v36_v13 = vld [vmem:[%s4078_s2 + $0x38] sm:$0xff] }
  0x11   :  { %v3604_v3 = vpack.c.bf16 %v34_v1, %v30_v0  ;;  %v38_v5 = vld [vmem:[%s4078_s2 + $0x48] sm:$0xff]  ;;  %v3617_v8 = vpack.c.bf16 %v33_v4, %v29_v2  ;;  %v37_v10 = vld [vmem:[%s4078_s2 + $0x40] sm:$0xff]  ;;  %v31_v14 = vld [vmem:[%s4078_s2 + $0x10] sm:$0xff]  ;;  %v3643_v17 = vpack.c.bf16 %v36_v13, %v32_v12 }
  0x12   :  { %v42_v6 = vld [vmem:[%s4078_s2 + $0x68] sm:$0xff]  ;;  %v41_v11 = vld [vmem:[%s4078_s2 + $0x60] sm:$0xff]  ;;  %v35_v15 = vld [vmem:[%s4078_s2 + $0x30] sm:$0xff] }
  0x13   :  { %v3619_v9 = vpack.c.bf16 %v42_v6, %v38_v5  ;;  %3132 = vmatprep.subr.bf16.mxu0 %v3604_v3  ;;  %v3641_v16 = vpack.c.bf16 %v41_v11, %v37_v10  ;;  %v3645_v18 = vpack.c.bf16 %v35_v15, %v31_v14  ;;  %v40_v19 = vld [vmem:[%s4078_s2 + $0x58] sm:$0xff]  ;;  %v39_v21 = vld [vmem:[%s4078_s2 + $0x50] sm:$0xff] }
  0x14   :  { %3134 = vmatpush1.bf16.msra.mxu0 %v3617_v8  ;;  %v44_v20 = vld [vmem:[%s4078_s2 + $0x78] sm:$0xff]  ;;  %v43_v23 = vld [vmem:[%s4078_s2 + $0x70] sm:$0xff] }
  0x15   :  { %3136 = vmatprep.subr.bf16.mxu0 %v3619_v9  ;;  %v3657_v22 = vpack.c.bf16 %v44_v20, %v40_v19 }
  0x16   :  { %19 = vsyncpa [#allocation6], 0  ;;  %3140 = vmatprep.subr.bf16.mxu1 %v3643_v17  ;;  %v3664_v24 = vpack.c.bf16 %v43_v23, %v39_v21  ;;  %s46_s2 = sld [smem:[#allocation3]]  ;;  %v69_v25 = vlaneseq  ;;  %vm110_vm0 = vcmask 1040384   ;;  %vm591_vm1 = vcmask 261120   ;;  %s2881_s23 = sld [smem:[#allocation3 + $0x1]] }
  0x17   :  { %3142 = vmatpush1.bf16.msra.mxu1 %v3645_v18  ;;  %s2878_s8 = sld [smem:[#allocation3 + $0x80]]  ;;  %s2884_s24 = sld [smem:[#allocation3 + $0x81]]  ;;  %vm3546_vm2 = vmmov 0   ;;  %vm2794_vm3 = vcmask 7168   ;;  %vm2796_vm4 = vcmask 15360   ;;  %vm2798_vm5 = vcmask 23552  }
  0x18   :  { %3138 = vmatpush1.bf16.msra.mxu0 %v3641_v16  ;;  %3144 = vmatprep.subr.bf16.mxu1 %v3657_v22  ;;  %v70_v26 = vshrl.u32 %v69_v25, 7  ;;  %vm2800_vm6 = vcmask 31744   ;;  %vm2802_vm7 = vcmask 39936   ;;  %vm2804_vm8 = vcmask 48128  }
  0x19   :  { %3148 = vmatprep.subr.bf16.mxu0 %v3604_v3  ;;  %vm2806_vm9 = vcmask 56320   ;;  %vm2808_vm10 = vcmask 58368  }
  0x1a   :  { %v3689_v28 = vsub.s32 0, %v70_v26  ;;  %v3691_v30 = vsub.s32 1, %v70_v26  ;;  %v3697_v35 = vsub.s32 2, %v70_v26  ;;  %v3703_v43 = vsub.s32 3, %v70_v26 }
  0x1b   :  { %660 = vmatmul.mubr.f32.vlgmr.msra.gmra.mrb[0].mxu0 %v3544_v7  ;;  %3146 = vmatpush1.bf16.msra.mxu1 %v3664_v24 }
  0x1c   :  { %3156 = vmatprep.subr.bf16.mxu1 %v3643_v17  ;;  %3150 = vmatpush1.bf16.msra.mxu0 %v3617_v8  ;;  %s47_s9 = sshra.s32 %s46_s2, 3  ;;  %s50_s11 = sand.u32 7, %s46_s2 }
  0x1d   :  { %3152 = vmatprep.subr.bf16.mxu0 %v3619_v9  ;;  %832 = vmatprep.mubr.f32.mxu0 %v3544_v7  ;;  %s59_s10 = sshra.s32 %s2878_s8, 3  ;;  %s2971_s12 = sshll.u32 %s47_s9, 5 }
  0x1e   :  { %731 = vmatmul.mubr.f32.vlgmr.msra.gmra.mrb[0].mxu1 %v3544_v7  ;;  %s62_s13 = sand.u32 7, %s2878_s8  ;;  %s2972_s14 = sshll.u32 %s59_s10, 5 }
  0x1f   :  { %3158 = vmatpush1.bf16.msra.mxu1 %v3645_v18  ;;  %903 = vmatprep.mubr.f32.mxu1 %v3544_v7  ;;  %s53_s15 = sadd.s32 %s2971_s12, %s50_s11  ;;  %s65_s16 = sadd.s32 %s2972_s14, %s62_s13 }
  0x20   :  { %3160 = vmatprep.subr.bf16.mxu1 %v3657_v22  ;;  %3154 = vmatpush1.bf16.msra.mxu0 %v3641_v16  ;;  %s54_s19 = scalar_lea.vmem %s4077_s1, %s53_s15  ;;  %s66_s22 = scalar_lea.vmem %s4077_s1, %s65_s16 }
  0x21   :  { %3164 = vmatprep.subr.bf16.mxu0 %v3604_v3  ;;  %v55_v27 = vld [vmem:[%s54_s19] ss:$8 sm:$0xf]  ;;  %s117_s25 = sshra.s32 %s2881_s23, 3  ;;  %s128_s26 = sshra.s32 %s2884_s24, 3 }
  0x22   :  { %v67_v29 = vld [vmem:[%s66_s22] ss:$8 sm:$0xf]  ;;  %v72_v31 = vrot.slane %v55_v27, %v3689_v28  ;;  %v76_v33 = vrot.slane %v55_v27, %v3691_v30  ;;  %v80_v39 = vrot.slane %v55_v27, %v3697_v35  ;;  %v84_v50 = vrot.slane %v55_v27, %v3703_v43  ;;  %s120_s27 = sand.u32 7, %s2881_s23  ;;  %s2973_s28 = sshll.u32 %s117_s25, 5 }
  0x23   :  { %3162 = vmatpush1.bf16.msra.mxu1 %v3664_v24  ;;  %v93_v32 = vrot.slane %v67_v29, %v3689_v28  ;;  %v97_v34 = vrot.slane %v67_v29, %v3691_v30  ;;  %v101_v40 = vrot.slane %v67_v29, %v3697_v35  ;;  %v105_v51 = vrot.slane %v67_v29, %v3703_v43  ;;  %s131_s29 = sand.u32 7, %s2884_s24  ;;  %s2974_s0 = sshll.u32 %s128_s26, 5 }
  0x24   :  { %3172 = vmatprep.subr.bf16.mxu1 %v3643_v17  ;;  %s123_s30 = sadd.s32 %s2973_s28, %s120_s27  ;;  %s134_s7 = sadd.s32 %s2974_s0, %s131_s29 }
  0x25   :  { %v111_v36 = vsel %vm110_vm0, %v72_v31, %v93_v32  ;;  %v112_v37 = vsel %vm110_vm0, %v76_v33, %v97_v34  ;;  %v113_v48 = vsel %vm110_vm0, %v80_v39, %v101_v40  ;;  %v114_v53 = vsel %vm110_vm0, %v84_v50, %v105_v51  ;;  %s124_s9 = scalar_lea.vmem %s4077_s1, %s123_s30  ;;  %s135_s12 = scalar_lea.vmem %s4077_s1, %s134_s7 }
  0x26   :  { %v125_v11 = vld [vmem:[%s124_s9] ss:$8 sm:$0xf]  ;;  %s2887_s13 = sld [smem:[#allocation3 + $0x2]]  ;;  %s2893_s29 = sld [smem:[#allocation3 + $0x3]] }
  0x27   :  { %v136_v12 = vld [vmem:[%s135_s12] ss:$8 sm:$0xf]  ;;  %v141_v13 = vrot.slane %v125_v11, %v3689_v28  ;;  %v145_v15 = vrot.slane %v125_v11, %v3691_v30  ;;  %v149_v31 = vrot.slane %v125_v11, %v3697_v35  ;;  %s2890_s14 = sld [smem:[#allocation3 + $0x82]]  ;;  %s2896_s0 = sld [smem:[#allocation3 + $0x83]] }
  0x28   :  { %v162_v14 = vrot.slane %v136_v12, %v3689_v28  ;;  %v166_v19 = vrot.slane %v136_v12, %v3691_v30  ;;  %v170_v32 = vrot.slane %v136_v12, %v3697_v35 }
  0x2a   :  { %v179_v20 = vsel %vm110_vm0, %v141_v13, %v162_v14  ;;  %v180_v21 = vsel %vm110_vm0, %v145_v15, %v166_v19  ;;  %v181_v39 = vsel %vm110_vm0, %v149_v31, %v170_v32 }
  0x2c   :  { %s185_s15 = sshra.s32 %s2887_s13, 3  ;;  %s188_s17 = sand.u32 7, %s2887_s13 }
  0x2d   :  { %s196_s16 = sshra.s32 %s2890_s14, 3  ;;  %s2975_s18 = sshll.u32 %s185_s15, 5 }
  0x2e   :  { %s199_s19 = sand.u32 7, %s2890_s14  ;;  %s2976_s20 = sshll.u32 %s196_s16, 5 }
  0x2f   :  { %s191_s21 = sadd.s32 %s2975_s18, %s188_s17  ;;  %s202_s22 = sadd.s32 %s2976_s20, %s199_s19 }
  0x30   :  { %s192_s25 = scalar_lea.vmem %s4077_s1, %s191_s21  ;;  %s203_s28 = scalar_lea.vmem %s4077_s1, %s202_s22 }
  0x31   :  { %s253_s30 = sshra.s32 %s2893_s29, 3  ;;  %s264_s7 = sshra.s32 %s2896_s0, 3 }
  0x32   :  { %s256_s2 = sand.u32 7, %s2893_s29  ;;  %s2977_s8 = sshll.u32 %s253_s30, 5 }
  0x33   :  { %s267_s9 = sand.u32 7, %s2896_s0  ;;  %s2978_s10 = sshll.u32 %s264_s7, 5 }
  0x34   :  { %s259_s11 = sadd.s32 %s2977_s8, %s256_s2  ;;  %s270_s12 = sadd.s32 %s2978_s10, %s267_s9 }
  0x35   :  { %s260_s15 = scalar_lea.vmem %s4077_s1, %s259_s11  ;;  %s271_s18 = scalar_lea.vmem %s4077_s1, %s270_s12 }
  0x36   :  { %s2899_s19 = sld [smem:[#allocation3 + $0x4]]  ;;  %s2905_s9 = sld [smem:[#allocation3 + $0x5]] }
  0x37   :  { %s2902_s20 = sld [smem:[#allocation3 + $0x84]]  ;;  %s2908_s10 = sld [smem:[#allocation3 + $0x85]] }
  0x3c   :  { %s321_s21 = sshra.s32 %s2899_s19, 3  ;;  %s324_s23 = sand.u32 7, %s2899_s19 }
  0x3d   :  { %s332_s22 = sshra.s32 %s2902_s20, 3  ;;  %s2979_s24 = sshll.u32 %s321_s21, 5 }
  0x3e   :  { %s2980_s26 = sshll.u32 %s332_s22, 5  ;;  %s327_s27 = sadd.s32 %s2979_s24, %s324_s23 }
  0x3f   :  { %s328_s30 = scalar_lea.vmem %s4077_s1, %s327_s27  ;;  %s389_s11 = sshra.s32 %s2905_s9, 3 }
  0x40   :  { %s400_s12 = sshra.s32 %s2908_s10, 3  ;;  %s392_s13 = sand.u32 7, %s2905_s9 }
  0x41   :  { %s2981_s14 = sshll.u32 %s389_s11, 5  ;;  %s2982_s16 = sshll.u32 %s400_s12, 5 }
  0x42   :  { %s395_s17 = sadd.s32 %s2981_s14, %s392_s13  ;;  %s2920_s23 = sld [smem:[#allocation3 + $0x87]] }
  0x43   :  { %s396_s21 = scalar_lea.vmem %s4077_s1, %s395_s17  ;;  %s3549_s12 = smov 2  }
  0x44   :  { %s3550_s13 = smov 1   ;;  %s3554_s17 = smov 5  }
  0x45   :  { %s3556_s19 = smov [#allocation5]  }
  0xee   :  { %v661_v38 = vpop.f32.mrb[0].mxu0 }
  0xef   :  { %v737_v41 = vadd.f32 %v661_v38, %v111_v36  ;;  %v663_v42 = vpop.f32.mrb[1].mxu0  ;;  %v174_v38 = vrot.slane %v136_v12, %v3703_v43 }
  0xf0   :  { %v738_v44 = vadd.f32 %v663_v42, %v112_v37  ;;  %v153_v37 = vrot.slane %v125_v11, %v3703_v43 }
  0xf1   :  { %v2923_v45 = vmul.f32 -1.442695, %v737_v41  ;;  %v732_v46 = vpop.f32.mrb[0].mxu1 }
  0xf2   :  { %v2924_v47 = vmul.f32 -1.442695, %v738_v44  ;;  %v734_v49 = vpop.f32.mrb[1].mxu1  ;;  %v739_v52 = vadd.f32 %v732_v46, %v113_v48  ;;  %v182_v41 = vsel %vm110_vm0, %v153_v37, %v174_v38 }
  0xf3   :  { %3339 = vpow2.f32 %v2923_v45  ;;  %v740_v55 = vadd.f32 %v734_v49, %v114_v53 }
  0xf4   :  { %3341 = vpow2.f32 %v2924_v47  ;;  %v2925_v54 = vmul.f32 -1.442695, %v739_v52 }
  0xf6   :  { %3343 = vpow2.f32 %v2925_v54 }
  0xf7   :  { %3345 = vtanh.f32 %v740_v55 }
  0xfd   :  { %v3340_v56 = vpop.eup %3339 }
  0xfe   :  { %v3342_v57 = vpop.eup %3341  ;;  %v750_v58 = vadd.f32 1.0, %v3340_v56 }
  0xff   :  { %v751_v59 = vadd.f32 1.0, %v3342_v57 }
 0x100   :  { %3347 = vrcp.f32 %v750_v58  ;;  %v3344_v60 = vpop.eup %3343 }
 0x101   :  { %3349 = vrcp.f32 %v751_v59  ;;  %v3346_v61 = vpop.eup %3345  ;;  %v752_v63 = vadd.f32 1.0, %v3344_v60  ;;  %v193_v60 = vld [vmem:[%s192_s25] ss:$8 sm:$0xf]  ;;  %s335_s25 = sand.u32 7, %s2902_s20  ;;  %s2818_s20 = sshll.u32 %s3556_s19, 4  ;;  %s2819_s20 = int_to_ptr.vmem [resolvable:$true] %s2818_s20 }
 0x102   :  { %v217_v14 = vrot.slane %v193_v60, %v3697_v35  ;;  %p3522_p6 = scmp.lt.s32.totalorder %s2819_s20, %s2819_s20 }
 0x103   :  { %3351 = vrcp.f32 %v752_v63 }
 0x10a   :  { %v3348_v62 = vpop.eup %3347 }
 0x10b   :  { %v3350_v0 = vpop.eup %3349  ;;  %v761_v1 = vmul.f32 %v3348_v62, %v3346_v61  ;;  %v204_v61 = vld [vmem:[%s203_s28] ss:$8 sm:$0xf]  ;;  %v209_v62 = vrot.slane %v193_v60, %v3689_v28  ;;  %s338_s28 = sadd.s32 %s2980_s26, %s335_s25  ;;  %s2911_s25 = sld [smem:[#allocation3 + $0x6]] }
 0x10c   :  { %v760_v2 = vmul.f32 0.0, %v3350_v0  ;;  %v230_v63 = vrot.slane %v204_v61, %v3689_v28  ;;  %v213_v0 = vrot.slane %v193_v60, %v3691_v30  ;;  %v238_v15 = vrot.slane %v204_v61, %v3697_v35  ;;  %s339_s8 = scalar_lea.vmem %s4077_s1, %s338_s28  ;;  %s2914_s26 = sld [smem:[#allocation3 + $0x86]] }
 0x10d   :  { %v3352_v5 = vpop.eup %3351 }
 0x10e   :  { %v3709_v4 = vadd.f32 %v761_v1, %v760_v2  ;;  %v234_v1 = vrot.slane %v204_v61, %v3691_v30  ;;  %v247_v2 = vsel %vm110_vm0, %v209_v62, %v230_v63 }
 0x110   :  { %3353 = vtanh.f32 %v3709_v4 }
 0x111   :  { %s457_s27 = sshra.s32 %s2911_s25, 3  ;;  %s460_s29 = sand.u32 7, %s2911_s25 }
 0x112   :  { %s468_s28 = sshra.s32 %s2914_s26, 3  ;;  %s2983_s0 = sshll.u32 %s457_s27, 5 }
 0x113   :  { %s2984_s7 = sshll.u32 %s468_s28, 5  ;;  %s463_s2 = sadd.s32 %s2983_s0, %s460_s29 }
 0x114   :  { %s464_s11 = scalar_lea.vmem %s4077_s1, %s463_s2  ;;  %s536_s25 = sshra.s32 %s2920_s23, 3 }
 0x115   :  { %s539_s28 = sand.u32 7, %s2920_s23  ;;  %s2986_s29 = sshll.u32 %s536_s25, 5 }
 0x11a   :  { %v3354_v6 = vpop.eup %3353 }
 0x11b   :  { %v3712_v10 = vmul.f32 %v3354_v6, %v3352_v5 }
 0x11d   :  { %2926 = vmatmul.mubr.msk.f32.vlgmr.msra.gmra.mrb[2].mxu0 %vm591_vm1, %v3712_v10  ;;  %2927 = vmatmul.mubr.msk.f32.vlgmr.msra.gmra.mrb[2].mxu1 %vm591_vm1, %v3712_v10 }
 0x11e   :  { %3166 = vmatpush1.bf16.msra.mxu0 %v3617_v8  ;;  %3174 = vmatpush1.bf16.msra.mxu1 %v3645_v18 }
 0x11f   :  { %3168 = vmatprep.subr.bf16.mxu0 %v3619_v9  ;;  %3176 = vmatprep.subr.bf16.mxu1 %v3657_v22 }
 0x120   :  { %1005 = vmatprep.mubr.f32.mxu0 %v3544_v7  ;;  %1076 = vmatprep.mubr.f32.mxu1 %v3544_v7 }
 0x122   :  { %3170 = vmatpush1.bf16.msra.mxu0 %v3641_v16  ;;  %3178 = vmatpush1.bf16.msra.mxu1 %v3664_v24 }
 0x123   :  { %3180 = vmatprep.subr.bf16.mxu0 %v3604_v3  ;;  %3188 = vmatprep.subr.bf16.mxu1 %v3643_v17 }
 0x1f0   :  { %v834_v23 = vpop.f32.mrb[2].mxu0  ;;  %v905_v25 = vpop.f32.mrb[2].mxu1 }
 0x1f1   :  { %v910_v26 = vadd.f32 %v834_v23, %v179_v20  ;;  %v836_v27 = vpop.f32.mrb[3].mxu0  ;;  %v907_v29 = vpop.f32.mrb[3].mxu1  ;;  %v912_v40 = vadd.f32 %v905_v25, %v181_v39  ;;  %v221_v23 = vrot.slane %v193_v60, %v3703_v43  ;;  %v242_v25 = vrot.slane %v204_v61, %v3703_v43 }
 0x1f2   :  { %v911_v33 = vadd.f32 %v836_v27, %v180_v21  ;;  %v913_v42 = vadd.f32 %v907_v29, %v182_v41 }
 0x1f3   :  { %v2928_v34 = vmul.f32 -1.442695, %v910_v26  ;;  %v2930_v44 = vmul.f32 -1.442695, %v912_v40  ;;  %v249_v26 = vsel %vm110_vm0, %v217_v14, %v238_v15  ;;  %v250_v29 = vsel %vm110_vm0, %v221_v23, %v242_v25 }
 0x1f4   :  { %v2929_v36 = vmul.f32 -1.442695, %v911_v33 }
 0x1f5   :  { %3355 = vpow2.f32 %v2928_v34 }
 0x1f6   :  { %3357 = vpow2.f32 %v2929_v36 }
 0x1f7   :  { %3359 = vtanh.f32 %v913_v42 }
 0x1f8   :  { %3361 = vpow2.f32 %v2930_v44 }
 0x1ff   :  { %v3356_v45 = vpop.eup %3355 }
 0x200   :  { %v923_v46 = vadd.f32 1.0, %v3356_v45  ;;  %v3358_v47 = vpop.eup %3357 }
 0x201   :  { %v924_v48 = vadd.f32 1.0, %v3358_v47  ;;  %v3360_v49 = vpop.eup %3359 }
 0x202   :  { %3363 = vrcp.f32 %v923_v46  ;;  %v3362_v50 = vpop.eup %3361 }
 0x203   :  { %3365 = vrcp.f32 %v924_v48  ;;  %v925_v54 = vadd.f32 1.0, %v3362_v50  ;;  %v261_v50 = vld [vmem:[%s260_s15] ss:$8 sm:$0xf]  ;;  %s403_s15 = sand.u32 7, %s2908_s10 }
 0x205   :  { %3367 = vrcp.f32 %v925_v54  ;;  %v281_v54 = vrot.slane %v261_v50, %v3691_v30 }
 0x20c   :  { %v3364_v51 = vpop.eup %3363 }
 0x20d   :  { %v934_v52 = vmul.f32 %v3364_v51, %v3360_v49  ;;  %v3366_v53 = vpop.eup %3365  ;;  %v272_v51 = vld [vmem:[%s271_s18] ss:$8 sm:$0xf]  ;;  %s406_s18 = sadd.s32 %s2982_s16, %s403_s15  ;;  %s3552_s15 = smov 3  }
 0x20e   :  { %v933_v55 = vmul.f32 %v3366_v53, %v3709_v4  ;;  %v248_v4 = vsel %vm110_vm0, %v213_v0, %v234_v1  ;;  %v298_v53 = vrot.slane %v272_v51, %v3689_v28  ;;  %v285_v0 = vrot.slane %v261_v50, %v3697_v35  ;;  %s407_s24 = scalar_lea.vmem %s4077_s1, %s406_s18  ;;  %s3553_s16 = smov 6  }
 0x20f   :  { %v3368_v57 = vpop.eup %3367  ;;  %v306_v1 = vrot.slane %v272_v51, %v3697_v35  ;;  %s3555_s18 = smov 7  }
 0x210   :  { %v3747_v56 = vadd.f32 %v934_v52, %v933_v55  ;;  %v277_v52 = vrot.slane %v261_v50, %v3689_v28  ;;  %v302_v55 = vrot.slane %v272_v51, %v3691_v30 }
 0x212   :  { %3369 = vtanh.f32 %v3747_v56 }
 0x21c   :  { %v3370_v58 = vpop.eup %3369 }
 0x21d   :  { %v3750_v59 = vmul.f32 %v3370_v58, %v3368_v57  ;;  %v316_v57 = vsel %vm110_vm0, %v281_v54, %v302_v55 }
 0x21f   :  { %2931 = vmatmul.mubr.msk.f32.vlgmr.msra.gmra.mrb[4].mxu0 %vm591_vm1, %v3750_v59  ;;  %2932 = vmatmul.mubr.msk.f32.vlgmr.msra.gmra.mrb[4].mxu1 %vm591_vm1, %v3750_v59 }
 0x220   :  { %3182 = vmatpush1.bf16.msra.mxu0 %v3617_v8  ;;  %3190 = vmatpush1.bf16.msra.mxu1 %v3645_v18 }
 0x221   :  { %3184 = vmatprep.subr.bf16.mxu0 %v3619_v9  ;;  %3192 = vmatprep.subr.bf16.mxu1 %v3657_v22 }
 0x222   :  { %1178 = vmatprep.mubr.f32.mxu0 %v3544_v7  ;;  %1249 = vmatprep.mubr.f32.mxu1 %v3544_v7 }
 0x224   :  { %3186 = vmatpush1.bf16.msra.mxu0 %v3641_v16  ;;  %3194 = vmatpush1.bf16.msra.mxu1 %v3664_v24 }
 0x225   :  { %3196 = vmatprep.subr.bf16.mxu0 %v3604_v3  ;;  %3204 = vmatprep.subr.bf16.mxu1 %v3643_v17 }
 0x2f2   :  { %v1007_v5 = vpop.f32.mrb[4].mxu0  ;;  %v1078_v6 = vpop.f32.mrb[4].mxu1 }
 0x2f3   :  { %v1083_v11 = vadd.f32 %v1007_v5, %v247_v2  ;;  %v1009_v12 = vpop.f32.mrb[5].mxu0  ;;  %v1080_v13 = vpop.f32.mrb[5].mxu1  ;;  %v1085_v27 = vadd.f32 %v1078_v6, %v249_v26  ;;  %v289_v6 = vrot.slane %v261_v50, %v3703_v43 }
 0x2f4   :  { %v1084_v19 = vadd.f32 %v1009_v12, %v248_v4  ;;  %v1086_v31 = vadd.f32 %v1080_v13, %v250_v29  ;;  %v317_v12 = vsel %vm110_vm0, %v285_v0, %v306_v1 }
 0x2f5   :  { %v2933_v20 = vmul.f32 -1.442695, %v1083_v11  ;;  %v2935_v32 = vmul.f32 -1.442695, %v1085_v27  ;;  %v310_v11 = vrot.slane %v272_v51, %v3703_v43 }
 0x2f6   :  { %v2934_v21 = vmul.f32 -1.442695, %v1084_v19 }
 0x2f7   :  { %3371 = vpow2.f32 %v2933_v20  ;;  %v318_v14 = vsel %vm110_vm0, %v289_v6, %v310_v11 }
 0x2f8   :  { %3373 = vpow2.f32 %v2934_v21 }
 0x2f9   :  { %3375 = vtanh.f32 %v1086_v31 }
 0x2fa   :  { %3377 = vpow2.f32 %v2935_v32 }
 0x301   :  { %v3372_v33 = vpop.eup %3371 }
 0x302   :  { %v1096_v34 = vadd.f32 1.0, %v3372_v33  ;;  %v3374_v36 = vpop.eup %3373 }
 0x303   :  { %v1097_v37 = vadd.f32 1.0, %v3374_v36  ;;  %v3376_v38 = vpop.eup %3375 }
 0x304   :  { %3379 = vrcp.f32 %v1096_v34  ;;  %v3378_v39 = vpop.eup %3377 }
 0x305   :  { %3381 = vrcp.f32 %v1097_v37  ;;  %v1098_v44 = vadd.f32 1.0, %v3378_v39 }
 0x307   :  { %3383 = vrcp.f32 %v1098_v44 }
 0x30e   :  { %v3380_v40 = vpop.eup %3379 }
 0x30f   :  { %v1107_v41 = vmul.f32 %v3380_v40, %v3376_v38  ;;  %v3382_v42 = vpop.eup %3381  ;;  %v329_v40 = vld [vmem:[%s328_s30] ss:$8 sm:$0xf]  ;;  %s471_s30 = sand.u32 7, %s2914_s26 }
 0x310   :  { %v1106_v45 = vmul.f32 %v3382_v42, %v3747_v56  ;;  %v315_v56 = vsel %vm110_vm0, %v277_v52, %v298_v53  ;;  %v345_v42 = vrot.slane %v329_v40, %v3689_v28  ;;  %v353_v55 = vrot.slane %v329_v40, %v3697_v35 }
 0x311   :  { %v3384_v47 = vpop.eup %3383 }
 0x312   :  { %v3785_v46 = vadd.f32 %v1107_v41, %v1106_v45  ;;  %v340_v41 = vld [vmem:[%s339_s8] ss:$8 sm:$0xf]  ;;  %v349_v45 = vrot.slane %v329_v40, %v3691_v30  ;;  %s474_s8 = sadd.s32 %s2984_s7, %s471_s30  ;;  %s542_s30 = sadd.s32 %s2986_s29, %s539_s28 }
 0x313   :  { %v366_v44 = vrot.slane %v340_v41, %v3689_v28  ;;  %s475_s14 = scalar_lea.vmem %s4077_s1, %s474_s8 }
 0x314   :  { %3385 = vtanh.f32 %v3785_v46 }
 0x31e   :  { %v3386_v48 = vpop.eup %3385 }
 0x31f   :  { %v3788_v49 = vmul.f32 %v3386_v48, %v3384_v47  ;;  %v383_v47 = vsel %vm110_vm0, %v345_v42, %v366_v44 }
 0x321   :  { %2936 = vmatmul.mubr.msk.f32.vlgmr.msra.gmra.mrb[6].mxu0 %vm591_vm1, %v3788_v49  ;;  %2937 = vmatmul.mubr.msk.f32.vlgmr.msra.gmra.mrb[6].mxu1 %vm591_vm1, %v3788_v49 }
 0x322   :  { %3198 = vmatpush1.bf16.msra.mxu0 %v3617_v8  ;;  %3206 = vmatpush1.bf16.msra.mxu1 %v3645_v18 }
 0x323   :  { %3200 = vmatprep.subr.bf16.mxu0 %v3619_v9  ;;  %3208 = vmatprep.subr.bf16.mxu1 %v3657_v22 }
 0x324   :  { %1351 = vmatprep.mubr.f32.mxu0 %v3544_v7  ;;  %1422 = vmatprep.mubr.f32.mxu1 %v3544_v7 }
 0x326   :  { %3202 = vmatpush1.bf16.msra.mxu0 %v3641_v16  ;;  %3210 = vmatpush1.bf16.msra.mxu1 %v3664_v24 }
 0x327   :  { %3212 = vmatprep.subr.bf16.mxu0 %v3604_v3  ;;  %3220 = vmatprep.subr.bf16.mxu1 %v3643_v17 }
 0x3f4   :  { %v1180_v58 = vpop.f32.mrb[6].mxu0  ;;  %v1251_v60 = vpop.f32.mrb[6].mxu1 }
 0x3f5   :  { %v1256_v61 = vadd.f32 %v1180_v58, %v315_v56  ;;  %v1182_v62 = vpop.f32.mrb[7].mxu0  ;;  %v1253_v63 = vpop.f32.mrb[7].mxu1  ;;  %v1258_v13 = vadd.f32 %v1251_v60, %v317_v12  ;;  %v374_v56 = vrot.slane %v340_v41, %v3697_v35 }
 0x3f6   :  { %v1257_v2 = vadd.f32 %v1182_v62, %v316_v57  ;;  %v1259_v15 = vadd.f32 %v1253_v63, %v318_v14  ;;  %v378_v62 = vrot.slane %v340_v41, %v3703_v43 }
 0x3f7   :  { %v2938_v4 = vmul.f32 -1.442695, %v1256_v61  ;;  %v2940_v19 = vmul.f32 -1.442695, %v1258_v13  ;;  %v357_v61 = vrot.slane %v329_v40, %v3703_v43  ;;  %v385_v63 = vsel %vm110_vm0, %v353_v55, %v374_v56 }
 0x3f8   :  { %v2939_v5 = vmul.f32 -1.442695, %v1257_v2 }
 0x3f9   :  { %3387 = vpow2.f32 %v2938_v4  ;;  %v386_v1 = vsel %vm110_vm0, %v357_v61, %v378_v62 }
 0x3fa   :  { %3389 = vpow2.f32 %v2939_v5 }
 0x3fb   :  { %3391 = vtanh.f32 %v1259_v15 }
 0x3fc   :  { %3393 = vpow2.f32 %v2940_v19 }
 0x403   :  { %v3388_v20 = vpop.eup %3387 }
 0x404   :  { %v1269_v21 = vadd.f32 1.0, %v3388_v20  ;;  %v3390_v23 = vpop.eup %3389 }
 0x405   :  { %v1270_v25 = vadd.f32 1.0, %v3390_v23  ;;  %v3392_v26 = vpop.eup %3391 }
 0x406   :  { %3395 = vrcp.f32 %v1269_v21  ;;  %v3394_v27 = vpop.eup %3393 }
 0x407   :  { %3397 = vrcp.f32 %v1270_v25  ;;  %v1271_v33 = vadd.f32 1.0, %v3394_v27 }
 0x409   :  { %3399 = vrcp.f32 %v1271_v33 }
 0x410   :  { %v3396_v29 = vpop.eup %3395 }
 0x411   :  { %v1280_v31 = vmul.f32 %v3396_v29, %v3392_v26  ;;  %v3398_v32 = vpop.eup %3397 }
 0x412   :  { %v1279_v34 = vmul.f32 %v3398_v32, %v3785_v46  ;;  %v370_v46 = vrot.slane %v340_v41, %v3691_v30 }
 0x413   :  { %v3400_v37 = vpop.eup %3399 }
 0x414   :  { %v3823_v36 = vadd.f32 %v1280_v31, %v1279_v34  ;;  %v384_v48 = vsel %vm110_vm0, %v349_v45, %v370_v46 }
 0x416   :  { %3401 = vtanh.f32 %v3823_v36 }
 0x420   :  { %v3402_v38 = vpop.eup %3401 }
 0x421   :  { %v3826_v39 = vmul.f32 %v3402_v38, %v3400_v37 }
 0x423   :  { %2941 = vmatmul.mubr.msk.f32.vlgmr.msra.gmra.mrb[8].mxu0 %vm591_vm1, %v3826_v39  ;;  %2942 = vmatmul.mubr.msk.f32.vlgmr.msra.gmra.mrb[8].mxu1 %vm591_vm1, %v3826_v39 }
 0x424   :  { %3214 = vmatpush1.bf16.msra.mxu0 %v3617_v8  ;;  %3222 = vmatpush1.bf16.msra.mxu1 %v3645_v18 }
 0x425   :  { %3216 = vmatprep.subr.bf16.mxu0 %v3619_v9  ;;  %3224 = vmatprep.subr.bf16.mxu1 %v3657_v22 }
 0x426   :  { %1524 = vmatprep.mubr.f32.mxu0 %v3544_v7  ;;  %1595 = vmatprep.mubr.f32.mxu1 %v3544_v7 }
 0x428   :  { %3218 = vmatpush1.bf16.msra.mxu0 %v3641_v16  ;;  %3226 = vmatpush1.bf16.msra.mxu1 %v3664_v24 }
 0x429   :  { %3228 = vmatprep.subr.bf16.mxu0 %v3604_v3  ;;  %3236 = vmatprep.subr.bf16.mxu1 %v3643_v17 }
 0x4f6   :  { %v1353_v50 = vpop.f32.mrb[8].mxu0  ;;  %v1424_v51 = vpop.f32.mrb[8].mxu1 }
 0x4f7   :  { %v1429_v52 = vadd.f32 %v1353_v50, %v383_v47  ;;  %v1355_v53 = vpop.f32.mrb[9].mxu0  ;;  %v1426_v54 = vpop.f32.mrb[9].mxu1  ;;  %v1431_v0 = vadd.f32 %v1424_v51, %v385_v63 }
 0x4f8   :  { %v1430_v57 = vadd.f32 %v1355_v53, %v384_v48  ;;  %v1432_v2 = vadd.f32 %v1426_v54, %v386_v1 }
 0x4f9   :  { %v2943_v58 = vmul.f32 -1.442695, %v1429_v52  ;;  %v2945_v4 = vmul.f32 -1.442695, %v1431_v0 }
 0x4fa   :  { %v2944_v60 = vmul.f32 -1.442695, %v1430_v57 }
 0x4fb   :  { %3403 = vpow2.f32 %v2943_v58 }
 0x4fc   :  { %3405 = vpow2.f32 %v2944_v60 }
 0x4fd   :  { %3407 = vtanh.f32 %v1432_v2 }
 0x4fe   :  { %3409 = vpow2.f32 %v2945_v4 }
 0x505   :  { %v3404_v5 = vpop.eup %3403 }
 0x506   :  { %v1442_v6 = vadd.f32 1.0, %v3404_v5  ;;  %v3406_v11 = vpop.eup %3405 }
 0x507   :  { %v1443_v12 = vadd.f32 1.0, %v3406_v11  ;;  %v3408_v13 = vpop.eup %3407 }
 0x508   :  { %3411 = vrcp.f32 %v1442_v6  ;;  %v3410_v14 = vpop.eup %3409 }
 0x509   :  { %3413 = vrcp.f32 %v1443_v12  ;;  %v1444_v21 = vadd.f32 1.0, %v3410_v14 }
 0x50b   :  { %3415 = vrcp.f32 %v1444_v21 }
 0x512   :  { %v3412_v15 = vpop.eup %3411 }
 0x513   :  { %v1453_v19 = vmul.f32 %v3412_v15, %v3408_v13  ;;  %v3414_v20 = vpop.eup %3413  ;;  %v3545_v15 = vmov 0.0|0.0  }
 0x514   :  { %v1452_v23 = vmul.f32 %v3414_v20, %v3823_v36 }
 0x515   :  { %v3416_v26 = vpop.eup %3415 }
 0x516   :  { %v3861_v25 = vadd.f32 %v1453_v19, %v1452_v23 }
 0x518   :  { %3417 = vtanh.f32 %v3861_v25 }
 0x522   :  { %v3418_v27 = vpop.eup %3417 }
 0x523   :  { %v3864_v29 = vmul.f32 %v3418_v27, %v3416_v26 }
 0x525   :  { %2946 = vmatmul.mubr.msk.f32.vlgmr.msra.gmra.mrb[10].mxu0 %vm591_vm1, %v3864_v29  ;;  %2947 = vmatmul.mubr.msk.f32.vlgmr.msra.gmra.mrb[10].mxu1 %vm591_vm1, %v3864_v29 }
 0x526   :  { %3230 = vmatpush1.bf16.msra.mxu0 %v3617_v8  ;;  %3238 = vmatpush1.bf16.msra.mxu1 %v3645_v18 }
 0x527   :  { %3232 = vmatprep.subr.bf16.mxu0 %v3619_v9  ;;  %3240 = vmatprep.subr.bf16.mxu1 %v3657_v22 }
 0x528   :  { %1697 = vmatprep.mubr.f32.mxu0 %v3544_v7  ;;  %1768 = vmatprep.mubr.f32.mxu1 %v3544_v7 }
 0x52a   :  { %3234 = vmatpush1.bf16.msra.mxu0 %v3641_v16  ;;  %3242 = vmatpush1.bf16.msra.mxu1 %v3664_v24 }
 0x52b   :  { %3244 = vmatprep.subr.bf16.mxu0 %v3604_v3  ;;  %3252 = vmatprep.subr.bf16.mxu1 %v3643_v17  ;;  %v397_v3 = vld [vmem:[%s396_s21] ss:$8 sm:$0xf]  ;;  %s3517_s21 = scalar_lea.vmem %s2819_s20, 32 }
 0x52c   :  { %v408_v17 = vld [vmem:[%s407_s24] ss:$8 sm:$0xf]  ;;  %v413_v31 = vrot.slane %v397_v3, %v3689_v28  ;;  %v417_v33 = vrot.slane %v397_v3, %v3691_v30  ;;  %v421_v45 = vrot.slane %v397_v3, %v3697_v35  ;;  %v425_v51 = vrot.slane %v397_v3, %v3703_v43  ;;  %p3518_p5 = scmp.ne.s32.totalorder %s2819_s20, %s3517_s21  ;;  %p3523_p7 = scmp.lt.s32.totalorder %s3517_s21, %s3517_s21 }
 0x52d   :  { %v434_v32 = vrot.slane %v408_v17, %v3689_v28  ;;  %v438_v34 = vrot.slane %v408_v17, %v3691_v30  ;;  %v442_v46 = vrot.slane %v408_v17, %v3697_v35  ;;  %v446_v52 = vrot.slane %v408_v17, %v3703_v43 }
 0x52e   :  { %p3524_p8 = por %p3523_p7, %p3522_p6 }
 0x52f   :  { %v451_v36 = vsel %vm110_vm0, %v413_v31, %v434_v32  ;;  %v452_v37 = vsel %vm110_vm0, %v417_v33, %v438_v34  ;;  %v453_v53 = vsel %vm110_vm0, %v421_v45, %v442_v46  ;;  %v454_v55 = vsel %vm110_vm0, %v425_v51, %v446_v52 }
 0x530   :  { %p3525_p9 = pnand %p3524_p8, %p3518_p5 }
 0x5f8   :  { %v1526_v38 = vpop.f32.mrb[10].mxu0  ;;  %v1597_v40 = vpop.f32.mrb[10].mxu1 }
 0x5f9   :  { %v1602_v41 = vadd.f32 %v1526_v38, %v451_v36  ;;  %v1528_v42 = vpop.f32.mrb[11].mxu0  ;;  %v1599_v44 = vpop.f32.mrb[11].mxu1  ;;  %v1604_v54 = vadd.f32 %v1597_v40, %v453_v53 }
 0x5fa   :  { %v1603_v47 = vadd.f32 %v1528_v42, %v452_v37  ;;  %v1605_v56 = vadd.f32 %v1599_v44, %v454_v55 }
 0x5fb   :  { %v2948_v48 = vmul.f32 -1.442695, %v1602_v41  ;;  %v2950_v57 = vmul.f32 -1.442695, %v1604_v54 }
 0x5fc   :  { %v2949_v50 = vmul.f32 -1.442695, %v1603_v47 }
 0x5fd   :  { %3419 = vpow2.f32 %v2948_v48 }
 0x5fe   :  { %3421 = vpow2.f32 %v2949_v50 }
 0x5ff   :  { %3423 = vtanh.f32 %v1605_v56 }
 0x600   :  { %3425 = vpow2.f32 %v2950_v57  ;;  %v3943_v57 = vld [vmem:[%s4079_s3] sm:$0xff] }
 0x607   :  { %v3420_v58 = vpop.eup %3419 }
 0x608   :  { %v1615_v60 = vadd.f32 1.0, %v3420_v58  ;;  %v3422_v61 = vpop.eup %3421  ;;  %v3948_v58 = vld [vmem:[%s4079_s3 + $0x8] sm:$0xff] }
 0x609   :  { %v1616_v62 = vadd.f32 1.0, %v3422_v61  ;;  %v3424_v63 = vpop.eup %3423 }
 0x60a   :  { %3427 = vrcp.f32 %v1615_v60  ;;  %v3426_v0 = vpop.eup %3425 }
 0x60b   :  { %3429 = vrcp.f32 %v1616_v62  ;;  %v1617_v5 = vadd.f32 1.0, %v3426_v0  ;;  %v3260_v62 = vpack.c.bf16 %v3948_v58, %v3943_v57  ;;  %v3959_v0 = vld [vmem:[%s4079_s3 + $0x10] sm:$0xff] }
 0x60d   :  { %3431 = vrcp.f32 %v1617_v5 }
 0x614   :  { %v3428_v1 = vpop.eup %3427 }
 0x615   :  { %v1626_v2 = vmul.f32 %v3428_v1, %v3424_v63  ;;  %v3430_v4 = vpop.eup %3429  ;;  %v3964_v1 = vld [vmem:[%s4079_s3 + $0x18] sm:$0xff]  ;;  %s2917_s3 = sld [smem:[#allocation3 + $0x7]] }
 0x616   :  { %v1625_v6 = vmul.f32 %v3430_v4, %v3861_v25 }
 0x617   :  { %v3432_v12 = vpop.eup %3431 }
 0x618   :  { %v3899_v11 = vadd.f32 %v1626_v2, %v1625_v6  ;;  %v3263_v2 = vpack.c.bf16 %v3964_v1, %v3959_v0 }
 0x61a   :  { %3433 = vtanh.f32 %v3899_v11 }
 0x61b   :  { %s525_s24 = sshra.s32 %s2917_s3, 3  ;;  %s528_s26 = sand.u32 7, %s2917_s3 }
 0x61c   :  { %s2985_s27 = sshll.u32 %s525_s24, 5 }
 0x61d   :  { %s531_s0 = sadd.s32 %s2985_s27, %s528_s26 }
 0x61e   :  { %s532_s8 = scalar_lea.vmem %s4077_s1, %s531_s0 }
 0x624   :  { %v3434_v13 = vpop.eup %3433 }
 0x625   :  { %v3902_v14 = vmul.f32 %v3434_v13, %v3432_v12 }
 0x627   :  { %2951 = vmatmul.mubr.msk.f32.vlgmr.msra.gmra.mrb[12].mxu0 %vm591_vm1, %v3902_v14  ;;  %2952 = vmatmul.mubr.msk.f32.vlgmr.msra.gmra.mrb[12].mxu1 %vm591_vm1, %v3902_v14 }
 0x628   :  { %3246 = vmatpush1.bf16.msra.mxu0 %v3617_v8  ;;  %3254 = vmatpush1.bf16.msra.mxu1 %v3645_v18  ;;  %v465_v8 = vld [vmem:[%s464_s11] ss:$8 sm:$0xf]  ;;  %s543_s11 = scalar_lea.vmem %s4077_s1, %s542_s30  ;;  %s3548_s1 = smov 127  }
 0x629   :  { %3248 = vmatprep.subr.bf16.mxu0 %v3619_v9  ;;  %3256 = vmatprep.subr.bf16.mxu1 %v3657_v22  ;;  %v476_v9 = vld [vmem:[%s475_s14] ss:$8 sm:$0xf]  ;;  %v485_v22 = vrot.slane %v465_v8, %v3691_v30  ;;  %v489_v3 = vrot.slane %v465_v8, %v3697_v35  ;;  %v493_v34 = vrot.slane %v465_v8, %v3703_v43  ;;  %s3551_s14 = smov 4  }
 0x62a   :  { %1870 = vmatprep.mubr.f32.mxu0 %v3544_v7  ;;  %1941 = vmatprep.mubr.f32.mxu1 %v3544_v7  ;;  %v502_v18 = vrot.slane %v476_v9, %v3689_v28  ;;  %v510_v17 = vrot.slane %v476_v9, %v3697_v35  ;;  %v514_v36 = vrot.slane %v476_v9, %v3703_v43 }
 0x62c   :  { %3250 = vmatpush1.bf16.msra.mxu0 %v3641_v16  ;;  %3258 = vmatpush1.bf16.msra.mxu1 %v3664_v24  ;;  %v481_v16 = vrot.slane %v465_v8, %v3689_v28  ;;  %v506_v24 = vrot.slane %v476_v9, %v3691_v30  ;;  %v521_v37 = vsel %vm110_vm0, %v489_v3, %v510_v17  ;;  %v533_v9 = vld [vmem:[%s532_s8] ss:$8 sm:$0xf] }
 0x62d   :  { %3259 = vmatprep.subr.bf16.mxu0 %v3545_v15  ;;  %3265 = vmatprep.subr.bf16.mxu1 %v3545_v15  ;;  %v522_v40 = vsel %vm110_vm0, %v493_v34, %v514_v36  ;;  %v557_v3 = vrot.slane %v533_v9, %v3697_v35 }
 0x62e   :  { %v519_v19 = vsel %vm110_vm0, %v481_v16, %v502_v18  ;;  %v520_v20 = vsel %vm110_vm0, %v485_v22, %v506_v24  ;;  %v549_v16 = vrot.slane %v533_v9, %v3689_v28  ;;  %v553_v22 = vrot.slane %v533_v9, %v3691_v30 }
 0x6fa   :  { %v1699_v21 = vpop.f32.mrb[12].mxu0  ;;  %v1770_v23 = vpop.f32.mrb[12].mxu1 }
 0x6fb   :  { %v1775_v25 = vadd.f32 %v1699_v21, %v519_v19  ;;  %v1701_v26 = vpop.f32.mrb[13].mxu0  ;;  %v1772_v27 = vpop.f32.mrb[13].mxu1  ;;  %v1777_v38 = vadd.f32 %v1770_v23, %v521_v37 }
 0x6fc   :  { %v1776_v31 = vadd.f32 %v1701_v26, %v520_v20  ;;  %v1778_v41 = vadd.f32 %v1772_v27, %v522_v40 }
 0x6fd   :  { %v2953_v32 = vmul.f32 -1.442695, %v1775_v25  ;;  %v2955_v42 = vmul.f32 -1.442695, %v1777_v38 }
 0x6fe   :  { %v2954_v33 = vmul.f32 -1.442695, %v1776_v31 }
 0x6ff   :  { %3435 = vpow2.f32 %v2953_v32 }
 0x700   :  { %3437 = vpow2.f32 %v2954_v33  ;;  %v561_v33 = vrot.slane %v533_v9, %v3703_v43 }
 0x701   :  { %3439 = vtanh.f32 %v1778_v41 }
 0x702   :  { %3441 = vpow2.f32 %v2955_v42 }
 0x709   :  { %v3436_v44 = vpop.eup %3435 }
 0x70a   :  { %v1788_v45 = vadd.f32 1.0, %v3436_v44  ;;  %v3438_v46 = vpop.eup %3437 }
 0x70b   :  { %v1789_v47 = vadd.f32 1.0, %v3438_v46  ;;  %v3440_v48 = vpop.eup %3439 }
 0x70c   :  { %3443 = vrcp.f32 %v1788_v45  ;;  %v3442_v50 = vpop.eup %3441 }
 0x70d   :  { %3445 = vrcp.f32 %v1789_v47  ;;  %v1790_v54 = vadd.f32 1.0, %v3442_v50 }
 0x70f   :  { %3447 = vrcp.f32 %v1790_v54 }
 0x716   :  { %v3444_v51 = vpop.eup %3443 }
 0x717   :  { %v1799_v52 = vmul.f32 %v3444_v51, %v3440_v48  ;;  %v3446_v53 = vpop.eup %3445 }
 0x718   :  { %v1798_v55 = vmul.f32 %v3446_v53, %v3899_v11 }
 0x719   :  { %v3448_v60 = vpop.eup %3447 }
 0x71a   :  { %v3937_v56 = vadd.f32 %v1799_v52, %v1798_v55 }
 0x71c   :  { %3449 = vtanh.f32 %v3937_v56 }
 0x71d   :  { %3451 = vtanh.f32 %v3712_v10 }
 0x71e   :  { %3453 = vtanh.f32 %v3750_v59 }
 0x71f   :  { %3455 = vtanh.f32 %v3788_v49 }
 0x720   :  { %3457 = vtanh.f32 %v3826_v39 }
 0x721   :  { %3459 = vtanh.f32 %v3864_v29 }
 0x722   :  { %3461 = vtanh.f32 %v3902_v14 }
 0x726   :  { %v3450_v61 = vpop.eup %3449 }
 0x727   :  { %v3954_v63 = vmul.f32 %v3450_v61, %v3448_v60  ;;  %v3452_v4 = vpop.eup %3451 }
 0x728   :  { %v3454_v5 = vpop.eup %3453 }
 0x729   :  { %2956 = vmatmul.mubr.msk.f32.vlgmr.msra.gmra.mrb[14].mxu0 %vm591_vm1, %v3954_v63  ;;  %2957 = vmatmul.mubr.msk.f32.vlgmr.msra.gmra.mrb[14].mxu1 %vm591_vm1, %v3954_v63  ;;  %v3456_v6 = vpop.eup %3455  ;;  %3463 = vtanh.f32 %v3954_v63 }
 0x72a   :  { %3261 = vmatpush3.bf16.msra.mxu0 %v3260_v62  ;;  %3267 = vmatpush3.bf16.msra.mxu1 %v3260_v62  ;;  %v3458_v11 = vpop.eup %3457 }
 0x72b   :  { %3262 = vmatprep.subr.bf16.mxu0 %v3545_v15  ;;  %3268 = vmatprep.subr.bf16.mxu1 %v3545_v15  ;;  %v3460_v12 = vpop.eup %3459 }
 0x72c   :  { %3040 = vmatprep.mubr.msk.f32.mxu0 %vm3546_vm2, %v3544_v7  ;;  %3051 = vmatprep.mubr.msk.f32.mxu1 %vm3546_vm2, %v3544_v7  ;;  %v3462_v13 = vpop.eup %3461 }
 0x72e   :  { %3264 = vmatpush3.bf16.msra.mxu0 %v3263_v2  ;;  %3270 = vmatpush3.bf16.msra.mxu1 %v3263_v2 }
 0x72f   :  { %3271 = vmatprep.subr.bf16.mxu0 %v3545_v15  ;;  %3277 = vmatprep.subr.bf16.mxu1 %v3545_v15 }
 0x731   :  { %3041 = vmatmul.mubr.msk.f32.vlgmr.msra.gmra.mrb[16].mxu0 %vm591_vm1, %v3452_v4  ;;  %3052 = vmatmul.mubr.msk.f32.vlgmr.msra.gmra.mrb[16].mxu1 %vm591_vm1, %v3454_v5 }
 0x732   :  { %3273 = vmatpush3.bf16.msra.mxu0 %v3260_v62  ;;  %3279 = vmatpush3.bf16.msra.mxu1 %v3260_v62 }
 0x733   :  { %3274 = vmatprep.subr.bf16.mxu0 %v3545_v15  ;;  %3280 = vmatprep.subr.bf16.mxu1 %v3545_v15  ;;  %v3464_v8 = vpop.eup %3463 }
 0x734   :  { %3062 = vmatprep.mubr.msk.f32.mxu0 %vm3546_vm2, %v3544_v7  ;;  %3073 = vmatprep.mubr.msk.f32.mxu1 %vm3546_vm2, %v3544_v7 }
 0x736   :  { %3276 = vmatpush3.bf16.msra.mxu0 %v3263_v2  ;;  %3282 = vmatpush3.bf16.msra.mxu1 %v3263_v2 }
 0x737   :  { %3283 = vmatprep.subr.bf16.mxu0 %v3545_v15  ;;  %3289 = vmatprep.subr.bf16.mxu1 %v3545_v15 }
 0x739   :  { %3063 = vmatmul.mubr.msk.f32.vlgmr.msra.gmra.mrb[18].mxu0 %vm591_vm1, %v3456_v6  ;;  %3074 = vmatmul.mubr.msk.f32.vlgmr.msra.gmra.mrb[18].mxu1 %vm591_vm1, %v3458_v11 }
 0x73a   :  { %3285 = vmatpush3.bf16.msra.mxu0 %v3260_v62  ;;  %3291 = vmatpush3.bf16.msra.mxu1 %v3260_v62 }
 0x73b   :  { %3286 = vmatprep.subr.bf16.mxu0 %v3545_v15  ;;  %3292 = vmatprep.subr.bf16.mxu1 %v3545_v15 }
 0x73c   :  { %3084 = vmatprep.mubr.msk.f32.mxu0 %vm3546_vm2, %v3544_v7  ;;  %3095 = vmatprep.mubr.msk.f32.mxu1 %vm3546_vm2, %v3544_v7 }
 0x73e   :  { %3288 = vmatpush3.bf16.msra.mxu0 %v3263_v2  ;;  %3294 = vmatpush3.bf16.msra.mxu1 %v3263_v2 }
 0x73f   :  { %3295 = vmatprep.subr.bf16.mxu0 %v3545_v15  ;;  %3301 = vmatprep.subr.bf16.mxu1 %v3545_v15 }
 0x741   :  { %3085 = vmatmul.mubr.msk.f32.vlgmr.msra.gmra.mrb[20].mxu0 %vm591_vm1, %v3460_v12  ;;  %3096 = vmatmul.mubr.msk.f32.vlgmr.msra.gmra.mrb[20].mxu1 %vm591_vm1, %v3462_v13 }
 0x742   :  { %3297 = vmatpush3.bf16.msra.mxu0 %v3260_v62  ;;  %3106 = vmatprep.mubr.msk.f32.mxu0 %vm3546_vm2, %v3544_v7 }
 0x743   :  { %3298 = vmatprep.subr.bf16.mxu0 %v3545_v15  ;;  %3303 = vmatpush3.bf16.msra.mxu1 %v3260_v62 }
 0x744   :  { %3304 = vmatprep.subr.bf16.mxu1 %v3545_v15  ;;  %3117 = vmatprep.mubr.msk.f32.mxu1 %vm3546_vm2, %v3544_v7 }
 0x746   :  { %3300 = vmatpush3.bf16.msra.mxu0 %v3263_v2 }
 0x747   :  { %3306 = vmatpush3.bf16.msra.mxu1 %v3263_v2  ;;  %3307 = vmatprep.subr.bf16.mxu0 %v3545_v15 }
 0x749   :  { %3107 = vmatmul.mubr.msk.f32.vlgmr.msra.gmra.mrb[22].mxu0 %vm591_vm1, %v3464_v8 }
 0x74a   :  { %3128 = vmatprep.mubr.msk.f32.mxu0 %vm3546_vm2, %v3544_v7  ;;  %v544_v7 = vld [vmem:[%s543_s11] ss:$8 sm:$0xf] }
 0x74b   :  { %v570_v18 = vrot.slane %v544_v7, %v3689_v28  ;;  %v574_v24 = vrot.slane %v544_v7, %v3691_v30  ;;  %v578_v17 = vrot.slane %v544_v7, %v3697_v35  ;;  %v582_v30 = vrot.slane %v544_v7, %v3703_v43 }
 0x74d   :  { %v587_v19 = vsel %vm110_vm0, %v549_v16, %v570_v18  ;;  %v588_v20 = vsel %vm110_vm0, %v553_v22, %v574_v24  ;;  %v589_v34 = vsel %vm110_vm0, %v557_v3, %v578_v17  ;;  %v590_v40 = vsel %vm110_vm0, %v561_v33, %v582_v30 }
 0x7fc   :  { %v1872_v21 = vpop.f32.mrb[14].mxu0  ;;  %v1943_v23 = vpop.f32.mrb[14].mxu1 }
 0x7fd   :  { %v1948_v25 = vadd.f32 %v1872_v21, %v587_v19  ;;  %v1874_v26 = vpop.f32.mrb[15].mxu0  ;;  %v1945_v27 = vpop.f32.mrb[15].mxu1  ;;  %v1950_v38 = vadd.f32 %v1943_v23, %v589_v34 }
 0x7fe   :  { %v1949_v31 = vadd.f32 %v1874_v26, %v588_v20  ;;  %v1951_v35 = vadd.f32 %v1945_v27, %v590_v40 }
 0x7ff   :  { %v2958_v32 = vmul.f32 -1.442695, %v1948_v25  ;;  %v2960_v45 = vmul.f32 -1.442695, %v1950_v38  ;;  %v3547_v25 = vmov 0  }
 0x800   :  { %v2959_v28 = vmul.f32 -1.442695, %v1949_v31  ;;  %3328 = vset.pattern.permute.xlu1 %v3547_v25  ;;  %3327 = vset.pattern.permute.xlu0 %v3547_v25 }
 0x801   :  { %3465 = vpow2.f32 %v2958_v32 }
 0x802   :  { %3467 = vpow2.f32 %v2959_v28 }
 0x803   :  { %3469 = vtanh.f32 %v1951_v35 }
 0x804   :  { %v2050_v36 = vpop.f32.mrb[16].mxu0  ;;  %v2124_v37 = vpop.f32.mrb[16].mxu1  ;;  %3471 = vpow2.f32 %v2960_v45 }
 0x805   :  { %v2572_v41 = vmax.f32 %v2050_v36, %v2124_v37  ;;  %v3042_v42 = vpop.f32.mrb[17].mxu0  ;;  %v3053_v44 = vpop.f32.mrb[17].mxu1 }
 0x80b   :  { %v3466_v46 = vpop.eup %3465 }
 0x80c   :  { %v1961_v47 = vadd.f32 1.0, %v3466_v46  ;;  %v2198_v48 = vpop.f32.mrb[18].mxu0  ;;  %v2272_v50 = vpop.f32.mrb[18].mxu1 }
 0x80d   :  { %v3468_v51 = vpop.eup %3467  ;;  %v2573_v43 = vmax.f32 %v2572_v41, %v2198_v48  ;;  %v3064_v52 = vpop.f32.mrb[19].mxu0 }
 0x80e   :  { %v3075_v53 = vpop.f32.mrb[19].mxu1  ;;  %3473 = vrcp.f32 %v1961_v47  ;;  %v1962_v54 = vadd.f32 1.0, %v3468_v51  ;;  %v3470_v5 = vpop.eup %3469 }
 0x80f   :  { %v2574_v55 = vmax.f32 %v2573_v43, %v2272_v50  ;;  %v3472_v6 = vpop.eup %3471 }
 0x810   :  { %3475 = vrcp.f32 %v1962_v54  ;;  %v1963_v9 = vadd.f32 1.0, %v3472_v6 }
 0x812   :  { %3477 = vrcp.f32 %v1963_v9 }
 0x814   :  { %v2346_v60 = vpop.f32.mrb[20].mxu0  ;;  %v2420_v61 = vpop.f32.mrb[20].mxu1 }
 0x815   :  { %v2575_v62 = vmax.f32 %v2574_v55, %v2346_v60  ;;  %v3086_v2 = vpop.f32.mrb[21].mxu0  ;;  %v3097_v4 = vpop.f32.mrb[21].mxu1 }
 0x817   :  { %v2576_v11 = vmax.f32 %v2575_v62, %v2420_v61 }
 0x818   :  { %v3474_v12 = vpop.eup %3473 }
 0x819   :  { %v1972_v13 = vmul.f32 %v3474_v12, %v3470_v5 }
 0x81a   :  { %v3476_v8 = vpop.eup %3475 }
 0x81b   :  { %v1971_v7 = vmul.f32 %v3476_v8, %v3937_v56 }
 0x81c   :  { %v2494_v16 = vpop.f32.mrb[22].mxu0  ;;  %v3478_v19 = vpop.eup %3477 }
 0x81d   :  { %v1973_v18 = vadd.f32 %v1972_v13, %v1971_v7  ;;  %v2577_v22 = vmax.f32 %v2576_v11, %v2494_v16  ;;  %v3108_v24 = vpop.f32.mrb[23].mxu0 }
 0x81f   :  { %3479 = vtanh.f32 %v1973_v18  ;;  %v3329_v18 = vpack.i.bf16 %v3948_v58, %v3943_v57 }
 0x829   :  { %v3480_v20 = vpop.eup %3479 }
 0x82a   :  { %v4036_v21 = vmul.f32 %v3480_v20, %v3478_v19 }
 0x82c   :  { %3481 = vtanh.f32 %v4036_v21 }
 0x836   :  { %v3482_v23 = vpop.eup %3481 }
 0x837   :  { %3118 = vmatmul.mubr.msk.f32.vlgmr.msra.gmra.mrb[22].mxu1 %vm591_vm1, %v3482_v23 }
 0x90a   :  { %v2568_v26 = vpop.f32.mrb[22].mxu1 }
 0x90b   :  { %v2578_v56 = vmax.f32 %v2577_v22, %v2568_v26  ;;  %v3119_v27 = vpop.f32.mrb[23].mxu1 }
 0x90d   :  { %v2579_v3 = vsub.f32 %v2050_v36, %v2578_v56  ;;  %v2582_v17 = vsub.f32 %v2124_v37, %v2578_v56  ;;  %v2588_v31 = vsub.f32 %v2272_v50, %v2578_v56  ;;  %v2591_v32 = vsub.f32 %v2346_v60, %v2578_v56 }
 0x90e   :  { %v2594_v28 = vsub.f32 %v2420_v61, %v2578_v56  ;;  %v2597_v33 = vsub.f32 %v2494_v16, %v2578_v56  ;;  %v2600_v30 = vsub.f32 %v2568_v26, %v2578_v56  ;;  %v2585_v34 = vsub.f32 %v2198_v48, %v2578_v56 }
 0x90f   :  { %v2580_v38 = vmul.f32 1.442695, %v2579_v3  ;;  %v2583_v40 = vmul.f32 1.442695, %v2582_v17  ;;  %v2589_v42 = vmul.f32 1.442695, %v2588_v31  ;;  %v3334_v16 = vpack.i.bf16 %v3964_v1, %v3959_v0 }
 0x910   :  { %v2586_v41 = vmul.f32 1.442695, %v2585_v34  ;;  %v2592_v44 = vmul.f32 1.442695, %v2591_v32  ;;  %v2595_v35 = vmul.f32 1.442695, %v2594_v28 }
 0x911   :  { %3483 = vpow2.f32 %v2580_v38  ;;  %v2598_v36 = vmul.f32 1.442695, %v2597_v33  ;;  %v2601_v47 = vmul.f32 1.442695, %v2600_v30 }
 0x912   :  { %3485 = vpow2.f32 %v2583_v40 }
 0x913   :  { %3487 = vpow2.f32 %v2586_v41 }
 0x914   :  { %3489 = vpow2.f32 %v2589_v42 }
 0x915   :  { %3491 = vpow2.f32 %v2592_v44 }
 0x916   :  { %3493 = vpow2.f32 %v2595_v35 }
 0x917   :  { %3495 = vpow2.f32 %v2598_v36 }
 0x918   :  { %3497 = vpow2.f32 %v2601_v47 }
 0x91b   :  { %v3484_v45 = vpop.eup %3483 }
 0x91c   :  { %v3486_v46 = vpop.eup %3485 }
 0x91d   :  { %v2603_v37 = vadd.f32 %v3486_v46, %v3484_v45  ;;  %v3488_v50 = vpop.eup %3487 }
 0x91e   :  { %v3490_v51 = vpop.eup %3489 }
 0x91f   :  { %v2604_v48 = vadd.f32 %v3488_v50, %v2603_v37  ;;  %v3492_v52 = vpop.eup %3491 }
 0x920   :  { %v3494_v54 = vpop.eup %3493 }
 0x921   :  { %v2605_v43 = vadd.f32 %v3490_v51, %v2604_v48  ;;  %v3496_v60 = vpop.eup %3495 }
 0x922   :  { %v3498_v62 = vpop.eup %3497 }
 0x923   :  { %v2606_v53 = vadd.f32 %v3492_v52, %v2605_v43 }
 0x925   :  { %v2607_v55 = vadd.f32 %v3494_v54, %v2606_v53 }
 0x927   :  { %v2608_v61 = vadd.f32 %v3496_v60, %v2607_v55 }
 0x929   :  { %v2609_v2 = vadd.f32 %v3498_v62, %v2608_v61 }
 0x92b   :  { %3499 = vrcp.f32 %v2609_v2 }
 0x935   :  { %v3500_v4 = vpop.eup %3499 }
 0x936   :  { %v2613_v5 = vmul.f32 %v3500_v4, %v3488_v50  ;;  %v4040_v6 = vmul.f32 %v3500_v4, %v3484_v45  ;;  %v2614_v11 = vmul.f32 %v3500_v4, %v3490_v51  ;;  %v2612_v12 = vmul.f32 %v3500_v4, %v3486_v46 }
 0x937   :  { %v2616_v13 = vmul.f32 %v3500_v4, %v3494_v54  ;;  %v2615_v8 = vmul.f32 %v3500_v4, %v3492_v52  ;;  %v2618_v9 = vmul.f32 %v3500_v4, %v3498_v62  ;;  %v2617_v7 = vmul.f32 %v3500_v4, %v3496_v60 }
 0x938   :  { %2634 = vperm.xlu1 %3328, %v2613_v5   ;;  %2621 = vperm.xlu0 %3327, %v4040_v6  }
 0x93c   :  { %2641 = vperm.xlu1 %3328, %v2614_v11   ;;  %2627 = vperm.xlu0 %3327, %v2612_v12  }
 0x940   :  { %2655 = vperm.xlu1 %3328, %v2616_v13   ;;  %2648 = vperm.xlu0 %3327, %v2615_v8  }
 0x944   :  { %2669 = vperm.xlu1 %3328, %v2618_v9   ;;  %2662 = vperm.xlu0 %3327, %v2617_v7  }
 0x948   :  { %3335 = vrot.lane.b32.xlu1 %v3334_v16, %s3548_s1  ;;  %3330 = vrot.lane.b32.xlu0 %v3329_v18, %s3548_s1 }
 0x94c   :  { %2776 = vrot.lane.b32.xlu1 %v2613_v5, %s3549_s12  ;;  %2773 = vrot.lane.b32.xlu0 %v2612_v12, %s3550_s13 }
 0x950   :  { %2782 = vrot.lane.b32.xlu1 %v2615_v8, %s3551_s14  ;;  %2779 = vrot.lane.b32.xlu0 %v2614_v11, %s3552_s15 }
 0x954   :  { %2788 = vrot.lane.b32.xlu1 %v2617_v7, %s3553_s16  ;;  %2785 = vrot.lane.b32.xlu0 %v2616_v13, %s3554_s17 }
 0x958   :  { %2791 = vrot.lane.b32.xlu0 %v2618_v9, %s3555_s18 }
 0x9b7   :  { %v2635_v0 = vpop.permute.xlu1 %2634  ;;  %v2622_v1 = vpop.permute.xlu0 %2621 }
 0x9b8   :  { %v2624_v22 = vmul.f32 %v2622_v1, %v3712_v10  ;;  %v2637_v19 = vmul.f32 %v2635_v0, %v3788_v49 }
 0x9bb   :  { %v2642_v57 = vpop.permute.xlu1 %2641  ;;  %v2628_v58 = vpop.permute.xlu0 %2627 }
 0x9bc   :  { %v2630_v24 = vmul.f32 %v2628_v58, %v3750_v59  ;;  %v2644_v26 = vmul.f32 %v2642_v57, %v3826_v39 }
 0x9be   :  { %v2631_v20 = vadd.f32 %v2630_v24, %v2624_v22 }
 0x9bf   :  { %v2656_v23 = vpop.permute.xlu1 %2655  ;;  %v2649_v25 = vpop.permute.xlu0 %2648 }
 0x9c0   :  { %v2638_v56 = vadd.f32 %v2637_v19, %v2631_v20  ;;  %v2651_v31 = vmul.f32 %v2649_v25, %v3864_v29  ;;  %v2658_v10 = vmul.f32 %v2656_v23, %v3902_v14 }
 0x9c2   :  { %v2645_v27 = vadd.f32 %v2644_v26, %v2638_v56 }
 0x9c3   :  { %v2670_v3 = vpop.permute.xlu1 %2669  ;;  %v2663_v17 = vpop.permute.xlu0 %2662 }
 0x9c4   :  { %v2652_v32 = vadd.f32 %v2651_v31, %v2645_v27  ;;  %v2665_v42 = vmul.f32 %v2663_v17, %v3954_v63  ;;  %v2672_v36 = vmul.f32 %v2670_v3, %v4036_v21 }
 0x9c6   :  { %v2659_v38 = vadd.f32 %v2658_v10, %v2652_v32 }
 0x9c7   :  { %v3336_v28 = vpop.permute.xlu1 %3335  ;;  %v3331_v33 = vpop.permute.xlu0 %3330 }
 0x9c8   :  { %v3333_v30 = vunpack.i.h.bf16 %v3331_v33  ;;  %v3338_v59 = vunpack.i.h.bf16 %v3336_v28  ;;  %v3337_v34 = vunpack.i.l.bf16 %v3336_v28  ;;  %v3332_v49 = vunpack.i.l.bf16 %v3331_v33 }
 0x9c9   :  { %v2666_v35 = vadd.f32 %v2665_v42, %v2659_v38 }
 0x9ca   :  { %v3308_v40 = vpack.c.bf16 %v3333_v30, %v3332_v49  ;;  %v3311_v29 = vpack.c.bf16 %v3338_v59, %v3337_v34 }
 0x9cb   :  { %v2777_v41 = vpop.permute.xlu1 %2776  ;;  %v2774_v39 = vpop.permute.xlu0 %2773  ;;  %v2673_v47 = vadd.f32 %v2672_v36, %v2666_v35 }
 0x9cc   :  { %v2795_v44 = vsel %vm2794_vm3, %v4040_v6, %v2774_v39  ;;  %3309 = vmatpush3.bf16.msra.mxu0 %v3308_v40 }
 0x9cd   :  { %3310 = vmatprep.subr.bf16.mxu0 %v3545_v15  ;;  %v2797_v45 = vsel %vm2796_vm4, %v2795_v44, %v2777_v41 }
 0x9cf   :  { %v2783_v14 = vpop.permute.xlu1 %2782  ;;  %v2780_v46 = vpop.permute.xlu0 %2779 }
 0x9d0   :  { %v2799_v37 = vsel %vm2798_vm5, %v2797_v45, %v2780_v46  ;;  %3312 = vmatpush3.bf16.msra.mxu0 %v3311_v29 }
 0x9d1   :  { %v2801_v63 = vsel %vm2800_vm6, %v2799_v37, %v2783_v14 }
 0x9d3   :  { %v2786_v50 = vpop.permute.xlu0 %2785  ;;  %v2789_v48 = vpop.permute.xlu1 %2788  ;;  %3129 = vmatmul.mubr.msk.f32.vlgmr.msra.gmra.mrb[24].mxu0 %vm591_vm1, %v2673_v47 }
 0x9d4   :  { %v2803_v51 = vsel %vm2802_vm7, %v2801_v63, %v2786_v50 }
 0x9d5   :  { %v2805_v15 = vsel %vm2804_vm8, %v2803_v51, %v2789_v48 }
 0x9d7   :  { %v2792_v43 = vpop.permute.xlu0 %2791 }
 0x9d8   :  { %v2807_v52 = vsel %vm2806_vm9, %v2805_v15, %v2792_v43 }
 0x9d9   :  { %2809 = vst.msk [vmem:[#allocation5] sm:$0x3] %vm2808_vm10, %v2807_v52 }
 0x9da   :  { %3528 = shalt.err (!%p3525_p9)
}
 0x9db   :  { %s3529_s23 = scalar_lea.hbm %s4082_s6, 32 }
 0x9dc   :  { %p3530_p10 = scmp.ne.s32.totalorder %s4082_s6, %s3529_s23  ;;  %p3533_p11 = scmp.lt.u32.totalorder %s3529_s23, %s4082_s6 }
 0x9de   :  { %p3535_p12 = pnand %p3533_p11, %p3530_p10 }
 0x9e0   :  { %3538 = shalt.err (!%p3535_p12)
}
 0x9e1   :  { %2821 = dma.vmem_to_hbm [thread:$0]  %s2819_s20, 32, %s4082_s6, [#allocation6]   ;;  %v2675_v21 = vstv %s4080_s4  ;;  %vm2771_vm11 = vcmask 1024  }
 0xaa6   :  { %v2761_v53 = vpop.f32.mrb[24].mxu0 }
 0xaa7   :  { %v2762_v54 = vadd.f32 %v2761_v53, %v2675_v21  ;;  %v3130_v55 = vpop.f32.mrb[25].mxu0 }
 0xaa9   :  { %v2970_v60 = vmul.f32 -1.442695, %v2762_v54 }
 0xaab   :  { %3501 = vpow2.f32 %v2970_v60 }
 0xab5   :  { %v3502_v61 = vpop.eup %3501 }
 0xab6   :  { %v2768_v62 = vadd.f32 1.0, %v3502_v61 }
 0xab8   :  { %3503 = vrcp.f32 %v2768_v62 }
 0xac2   :  { %v3504_v2 = vpop.eup %3503 }
 0xac3   :  { %2772 = vst.msk [vmem:[%s4081_s5] sm:$0x3] %vm2771_vm11, %v3504_v2 }
 0xac4   :  { %3541 = dma.done.wait [#allocation6], 32  }
 0xac5   :  { %3542 = vsyncadd [#allocation6], 4294967264 }
 0xac6   :  { %2827 = vsyncpa [#allocation6], 1 }

</bundles_post_ra>
